<compile_context>
chip_gen: v5e
topology: v5e:2x2
jax: 0.10.0
libtpu: 0.0.40
codegen_flags: <defaults>
</compile_context>

<pallas_src>
import functools

import jax
import jax.numpy as jnp
from jax import lax
from jax.experimental import pallas as pl
from jax.experimental.pallas import tpu as pltpu


def _sequence_kernel(x_ref, wih1_ref, whh1_ref, b1_ref,
                     w2ih_ref, w2hh_ref, b2_ref,
                     wfb_ref, bfb_ref, wlin_ref, blin_ref,
                     out_ref, xproj_ref,
                     *, hidden, input_size, seq_len, future):
    B = x_ref.shape[1]
    H = hidden
    G = 4 * H
    total = seq_len + future

    whh1 = whh1_ref[...]          # (H, 4H)   g-columns pre-scaled by 2
    w2ih = w2ih_ref[...]          # (H, 4H)   layer-2 input-half weights
    w2hh = w2hh_ref[...]          # (H, 4H)   layer-2 recurrent-half weights
    wfb = wfb_ref[...]            # (H, 4H)   W_lin^T @ W_ih1 (future feedback fold)
    wlin = wlin_ref[...]          # (1, H)    output Linear weight (row vector)

    # Broadcast the biases to (B, 4H) exactly once (loops below are fully unrolled,
    # so these broadcasts are not re-materialized per step).
    b1b = jnp.broadcast_to(b1_ref[...], (B, G))
    b2b = jnp.broadcast_to(b2_ref[...], (B, G))
    bfbb = jnp.broadcast_to(bfb_ref[...], (B, G))

    def gates(g, c):
        # One EUP sigmoid over the full (B, 4H) tile; g-gate tanh recovered as 2*s - 1
        # because the g-gate columns of the weights/biases were pre-scaled by 2.
        s = jax.nn.sigmoid(g)
        i = s[:, 0 * H:1 * H]
        f = s[:, 1 * H:2 * H]
        gg = 2.0 * s[:, 2 * H:3 * H] - 1.0
        o = s[:, 3 * H:4 * H]
        c_new = f * c + i * gg
        h_new = o * jnp.tanh(c_new)
        return h_new, c_new

    # Hoisted layer-1 input projection (+ combined bias): one vectorized expression over
    # the whole (T, B, I) block, parked in VMEM scratch (keeps vreg pressure low).
    if input_size == 1:
        xproj_ref[...] = x_ref[...] * wih1_ref[...] + b1_ref[...]       # (T, B, 4H)
    else:
        x_flat = x_ref[...].reshape(seq_len * B, input_size)
        xproj_ref[...] = (jnp.dot(x_flat, wih1_ref[...],
                                  preferred_element_type=jnp.float32)
                          .reshape(seq_len, B, G) + b1_ref[...])

    h1 = jnp.zeros((B, H), jnp.float32)
    c1 = jnp.zeros((B, H), jnp.float32)
    h2 = jnp.zeros((B, H), jnp.float32)
    c2 = jnp.zeros((B, H), jnp.float32)

    # Output accumulated in registers; single lane-dense store at the end.
    col = lax.broadcasted_iota(jnp.int32, (1, total), 1)
    out_acc = jnp.zeros((B, total), jnp.float32)

    def emit(out_acc, h2, t):
        # y = h2 @ W_lin^T  (bias added once at the very end). VPU mult + lane reduce,
        # off the recurrence critical path.
        y = jnp.sum(h2 * wlin, axis=1, keepdims=True)      # (B, 1)
        return jnp.where(col == t, y, out_acc)

    # ---- main recurrence over the provided sequence ----
    for t in range(seq_len):
        # Previous-state half of layer 2: independent of this step's layer-1 update,
        # so the MXU can issue it while layer 1 is still computing.
        g2_prev = jnp.dot(h2, w2hh, preferred_element_type=jnp.float32) + b2b
        g1 = xproj_ref[t] + jnp.dot(h1, whh1, preferred_element_type=jnp.float32)
        h1, c1 = gates(g1, c1)
        g2 = g2_prev + jnp.dot(h1, w2ih, preferred_element_type=jnp.float32)
        h2, c2 = gates(g2, c2)
        out_acc = emit(out_acc, h2, t)

    # ---- autoregressive `future` steps (output fed back as input) ----
    # The Linear is folded into layer-1's gates:
    #   gates1 = h1 @ W_hh1 + (h2 @ W_lin^T + b_lin) @ W_ih1 + b1
    #          = h1 @ W_hh1 + h2 @ (W_lin^T @ W_ih1) + (b_lin * W_ih1 + b1)
    for k in range(future):
        g2_prev = jnp.dot(h2, w2hh, preferred_element_type=jnp.float32) + b2b
        g1 = (jnp.dot(h1, whh1, preferred_element_type=jnp.float32)
              + jnp.dot(h2, wfb, preferred_element_type=jnp.float32) + bfbb)
        h1, c1 = gates(g1, c1)
        g2 = g2_prev + jnp.dot(h1, w2ih, preferred_element_type=jnp.float32)
        h2, c2 = gates(g2, c2)
        out_acc = emit(out_acc, h2, seq_len + k)

    # Single store; add the Linear bias once for every timestep.
    out_ref[...] = out_acc + blin_ref[...]


def sequence_forward(x, params, *, hidden, future=0, batch_tile=8):
    """x: (batch, seq, input_size), batch-first like the PyTorch module."""
    batch, seq_len, input_size = x.shape
    if future > 0:
        assert input_size == 1, "feedback of the scalar output requires input_size == 1"

    (w_ih1, w_hh1, b_ih1, b_hh1,
     w_ih2, w_hh2, b_ih2, b_hh2,
     w_lin, b_lin) = [p.astype(jnp.float32) for p in params]

    H = hidden
    G = 4 * H
    total = seq_len + future

    # Pre-scale the g-gate columns by 2 so the kernel can use a single full-width
    # sigmoid and recover tanh(z) = 2*sigmoid(2z) - 1.
    gscale = jnp.concatenate(
        [jnp.ones((2 * H,), jnp.float32),
         2.0 * jnp.ones((H,), jnp.float32),
         jnp.ones((H,), jnp.float32)])[None, :]            # (1, 4H)

    wih1_t = w_ih1.T * gscale                              # (I, 4H)
    whh1_t = w_hh1.T * gscale                              # (H, 4H)
    b1 = ((b_ih1 + b_hh1)[None, :]) * gscale               # (1, 4H)
    w2ih = w_ih2.T * gscale                                # (H, 4H)  layer-2 input half
    w2hh = w_hh2.T * gscale                                # (H, 4H)  layer-2 recurrent half
    b2 = ((b_ih2 + b_hh2)[None, :]) * gscale               # (1, 4H)

    wlin_row = w_lin                                       # (1, H)
    blin = b_lin[None, :]                                  # (1, 1)

    if input_size == 1:
        w_fb = jnp.dot(w_lin.T, wih1_t)                    # (H, 4H), g-scaling inherited
        b_fb = b_lin[0] * wih1_t + b1                      # (1, 4H)
    else:
        w_fb = jnp.zeros((H, G), jnp.float32)              # unused when future == 0
        b_fb = b1

    # Time-major input, batch padded to a multiple of the (8-aligned) batch tile.
    assert batch_tile % 8 == 0
    b_pad = -(-batch // batch_tile) * batch_tile
    x_tm = jnp.transpose(x, (1, 0, 2)).astype(jnp.float32)  # (T, B, I)
    if b_pad != batch:
        x_tm = jnp.pad(x_tm, ((0, 0), (0, b_pad - batch), (0, 0)))

    kernel = functools.partial(_sequence_kernel, hidden=H, input_size=input_size,
                               seq_len=seq_len, future=future)

    def full_spec(shape):
        return pl.BlockSpec(shape, lambda i, n=len(shape): (0,) * n)

    out = pl.pallas_call(
        kernel,
        out_shape=jax.ShapeDtypeStruct((b_pad, total), jnp.float32),
        grid=(b_pad // batch_tile,),
        in_specs=[
            pl.BlockSpec((seq_len, batch_tile, input_size), lambda i: (0, i, 0)),  # x
            full_spec((input_size, G)),   # wih1
            full_spec((H, G)),            # whh1
            full_spec((1, G)),            # b1
            full_spec((H, G)),            # w2_ih
            full_spec((H, G)),            # w2_hh
            full_spec((1, G)),            # b2
            full_spec((H, G)),            # w_fb
            full_spec((1, G)),            # b_fb
            full_spec((1, H)),            # w_lin
            full_spec((1, 1)),            # b_lin
        ],
        out_specs=pl.BlockSpec((batch_tile, total), lambda i: (i, 0)),
        scratch_shapes=[pltpu.VMEM((seq_len, batch_tile, G), jnp.float32)],
        compiler_params=pltpu.CompilerParams(dimension_semantics=("parallel",)),
    )(x_tm, wih1_t, whh1_t, b1, w2ih, w2hh, b2, w_fb, b_fb, wlin_row, blin)

    # (B_pad, T+future) -> (batch, T+future), matching torch.stack(outputs, 1).squeeze(2)
    return out[:batch]


def sequence_reference(x, params, *, hidden, future=0):
    """Pure-JAX reference of the PyTorch forward pass (for verification)."""
    (w_ih1, w_hh1, b_ih1, b_hh1,
     w_ih2, w_hh2, b_ih2, b_hh2,
     w_lin, b_lin) = params
    batch, seq_len, _ = x.shape

    def cell(xt, h, c, w_ih, w_hh, bi, bh):
        g = xt @ w_ih.T + bi + h @ w_hh.T + bh
        i, f, gg, o = jnp.split(g, 4, axis=1)
        c_new = jax.nn.sigmoid(f) * c + jax.nn.sigmoid(i) * jnp.tanh(gg)
        h_new = jax.nn.sigmoid(o) * jnp.tanh(c_new)
        return h_new, c_new

    h1 = c1 = h2 = c2 = jnp.zeros((batch, hidden), jnp.float32)
    outs = []
    y = None
    for t in range(seq_len):
        h1, c1 = cell(x[:, t, :], h1, c1, w_ih1, w_hh1, b_ih1, b_hh1)
        h2, c2 = cell(h1, h2, c2, w_ih2, w_hh2, b_ih2, b_hh2)
        y = h2 @ w_lin.T + b_lin
        outs.append(y)
    for _ in range(future):
        h1, c1 = cell(y, h1, c1, w_ih1, w_hh1, b_ih1, b_hh1)
        h2, c2 = cell(h1, h2, c2, w_ih2, w_hh2, b_ih2, b_hh2)
        y = h2 @ w_lin.T + b_lin
        outs.append(y)
    return jnp.stack(outs, axis=1)[:, :, 0]


def make_params(key, input_size, hidden):
    """Deterministic init with PyTorch parameter shapes (uniform(-1/sqrt(H), 1/sqrt(H)))."""
    ks = jax.random.split(key, 10)
    s = 1.0 / (hidden ** 0.5)
    u = lambda k, shape: jax.random.uniform(k, shape, jnp.float32, -s, s)
    return (
        u(ks[0], (4 * hidden, input_size)),   # lstm1.weight_ih
        u(ks[1], (4 * hidden, hidden)),       # lstm1.weight_hh
        u(ks[2], (4 * hidden,)),              # lstm1.bias_ih
        u(ks[3], (4 * hidden,)),              # lstm1.bias_hh
        u(ks[4], (4 * hidden, hidden)),       # lstm2.weight_ih
        u(ks[5], (4 * hidden, hidden)),       # lstm2.weight_hh
        u(ks[6], (4 * hidden,)),              # lstm2.bias_ih
        u(ks[7], (4 * hidden,)),              # lstm2.bias_hh
        u(ks[8], (1, hidden)),                # linear.weight
        u(ks[9], (1,)),                       # linear.bias
    )


if __name__ == "__main__":
    BATCH, SEQ, INPUT_SIZE, HIDDEN = 2, 8, 1, 32
    FUTURE = 2

    root = jax.random.PRNGKey(0)
    k_params, k_x = jax.random.split(root)
    params = make_params(k_params, INPUT_SIZE, HIDDEN)
    x = jax.random.normal(k_x, (BATCH, SEQ, INPUT_SIZE), jnp.float32)

    out = sequence_forward(x, params, hidden=HIDDEN, future=FUTURE)
    out = jax.block_until_ready(out)

    ref = sequence_reference(x, params, hidden=HIDDEN, future=FUTURE)
    assert out.shape == (BATCH, SEQ + FUTURE), out.shape
    assert jnp.allclose(out, ref, atol=1e-4, rtol=1e-4), "mismatch vs reference"

    print("KERNEL_OK")
</pallas_src>

<mosaic_0001>
module attributes {stable_mosaic.version = 11 : i64} {
  func.func @_sequence_kernel(%arg0: i32, %arg1: memref<8x8x1xf32, #tpu.memory_space<vmem>>, %arg2: memref<1x128xf32, #tpu.memory_space<vmem>>, %arg3: memref<32x128xf32, #tpu.memory_space<vmem>>, %arg4: memref<1x128xf32, #tpu.memory_space<vmem>>, %arg5: memref<32x128xf32, #tpu.memory_space<vmem>>, %arg6: memref<32x128xf32, #tpu.memory_space<vmem>>, %arg7: memref<1x128xf32, #tpu.memory_space<vmem>>, %arg8: memref<32x128xf32, #tpu.memory_space<vmem>>, %arg9: memref<1x128xf32, #tpu.memory_space<vmem>>, %arg10: memref<1x32xf32, #tpu.memory_space<vmem>>, %arg11: memref<1x1xf32, #tpu.memory_space<vmem>>, %arg12: memref<8x10xf32, #tpu.memory_space<vmem>>, %arg13: memref<8x8x128xf32, #tpu.memory_space<vmem>>) attributes {dimension_semantics = [#tpu.dimension_semantics<parallel>], iteration_bounds = array<i64: 1>, scalar_prefetch = 0 : i64, scratch_operands = 1 : i64, tpu.core_type = #tpu.core_type<tc>, window_params = [{transform_indices = @transform_0, window_bounds = array<i64: 8, 8, 1>}, {pipeline_mode = #tpu.pipeline_mode<synchronous>, transform_indices = @transform_1, window_bounds = array<i64: 1, 128>}, {pipeline_mode = #tpu.pipeline_mode<synchronous>, transform_indices = @transform_2, window_bounds = array<i64: 32, 128>}, {pipeline_mode = #tpu.pipeline_mode<synchronous>, transform_indices = @transform_3, window_bounds = array<i64: 1, 128>}, {pipeline_mode = #tpu.pipeline_mode<synchronous>, transform_indices = @transform_4, window_bounds = array<i64: 32, 128>}, {pipeline_mode = #tpu.pipeline_mode<synchronous>, transform_indices = @transform_5, window_bounds = array<i64: 32, 128>}, {pipeline_mode = #tpu.pipeline_mode<synchronous>, transform_indices = @transform_6, window_bounds = array<i64: 1, 128>}, {pipeline_mode = #tpu.pipeline_mode<synchronous>, transform_indices = @transform_7, window_bounds = array<i64: 32, 128>}, {pipeline_mode = #tpu.pipeline_mode<synchronous>, transform_indices = @transform_8, window_bounds = array<i64: 1, 128>}, {pipeline_mode = #tpu.pipeline_mode<synchronous>, transform_indices = @transform_9, window_bounds = array<i64: 1, 32>}, {pipeline_mode = #tpu.pipeline_mode<synchronous>, transform_indices = @transform_10, window_bounds = array<i64: 1, 1>}, {transform_indices = @transform_11, window_bounds = array<i64: 8, 10>}]} {
    %c0 = arith.constant 0 : index
    %c0_0 = arith.constant 0 : index
    %0 = vector.load %arg3[%c0, %c0_0] : memref<32x128xf32, #tpu.memory_space<vmem>>, vector<32x128xf32>
    %c0_1 = arith.constant 0 : index
    %c0_2 = arith.constant 0 : index
    %1 = vector.load %arg5[%c0_1, %c0_2] : memref<32x128xf32, #tpu.memory_space<vmem>>, vector<32x128xf32>
    %c0_3 = arith.constant 0 : index
    %c0_4 = arith.constant 0 : index
    %2 = vector.load %arg6[%c0_3, %c0_4] : memref<32x128xf32, #tpu.memory_space<vmem>>, vector<32x128xf32>
    %c0_5 = arith.constant 0 : index
    %c0_6 = arith.constant 0 : index
    %3 = vector.load %arg8[%c0_5, %c0_6] : memref<32x128xf32, #tpu.memory_space<vmem>>, vector<32x128xf32>
    %c0_7 = arith.constant 0 : index
    %c0_8 = arith.constant 0 : index
    %4 = vector.load %arg10[%c0_7, %c0_8] : memref<1x32xf32, #tpu.memory_space<vmem>>, vector<1x32xf32>
    %c0_9 = arith.constant 0 : index
    %c0_10 = arith.constant 0 : index
    %5 = vector.load %arg7[%c0_9, %c0_10] : memref<1x128xf32, #tpu.memory_space<vmem>>, vector<1x128xf32>
    %6 = vector.shape_cast %5 : vector<1x128xf32> to vector<1x128xf32>
    %7 = vector.broadcast %6 : vector<1x128xf32> to vector<8x128xf32>
    %c0_11 = arith.constant 0 : index
    %c0_12 = arith.constant 0 : index
    %8 = vector.load %arg9[%c0_11, %c0_12] : memref<1x128xf32, #tpu.memory_space<vmem>>, vector<1x128xf32>
    %9 = vector.shape_cast %8 : vector<1x128xf32> to vector<1x128xf32>
    %10 = vector.broadcast %9 : vector<1x128xf32> to vector<8x128xf32>
    %c0_13 = arith.constant 0 : index
    %c0_14 = arith.constant 0 : index
    %c0_15 = arith.constant 0 : index
    %11 = vector.load %arg1[%c0_13, %c0_14, %c0_15] : memref<8x8x1xf32, #tpu.memory_space<vmem>>, vector<8x8x1xf32>
    %c0_16 = arith.constant 0 : index
    %c0_17 = arith.constant 0 : index
    %12 = vector.load %arg2[%c0_16, %c0_17] : memref<1x128xf32, #tpu.memory_space<vmem>>, vector<1x128xf32>
    %13 = vector.shape_cast %12 : vector<1x128xf32> to vector<1x1x128xf32>
    %14 = vector.broadcast %11 : vector<8x8x1xf32> to vector<8x8x128xf32>
    %15 = vector.broadcast %13 : vector<1x1x128xf32> to vector<8x8x128xf32>
    %16 = arith.mulf %14, %15 : vector<8x8x128xf32>
    %c0_18 = arith.constant 0 : index
    %c0_19 = arith.constant 0 : index
    %17 = vector.load %arg4[%c0_18, %c0_19] : memref<1x128xf32, #tpu.memory_space<vmem>>, vector<1x128xf32>
    %18 = vector.shape_cast %17 : vector<1x128xf32> to vector<1x1x128xf32>
    %19 = vector.broadcast %18 : vector<1x1x128xf32> to vector<8x8x128xf32>
    %20 = arith.addf %16, %19 : vector<8x8x128xf32>
    %c0_20 = arith.constant 0 : index
    %c0_21 = arith.constant 0 : index
    %c0_22 = arith.constant 0 : index
    %21 = vector.load %arg13[%c0_20, %c0_21, %c0_22] : memref<8x8x128xf32, #tpu.memory_space<vmem>>, vector<8x8x128xf32>
    tpu.vector_store %arg13[%c0_20, %c0_21, %c0_22], %20 {strides = array<i32>} : memref<8x8x128xf32, #tpu.memory_space<vmem>>, vector<8x8x128xf32>,
    %cst = arith.constant 0.000000e+00 : f32
    %22 = vector.broadcast %cst : f32 to vector<8x32xf32>
    %cst_23 = arith.constant 0.000000e+00 : f32
    %23 = vector.broadcast %cst_23 : f32 to vector<8x32xf32>
    %cst_24 = arith.constant 0.000000e+00 : f32
    %24 = vector.broadcast %cst_24 : f32 to vector<8x32xf32>
    %cst_25 = arith.constant 0.000000e+00 : f32
    %25 = vector.broadcast %cst_25 : f32 to vector<8x32xf32>
    %26 = tpu.iota {dimensions = array<i32: 1>} : vector<1x10xi32>
    %cst_26 = arith.constant 0.000000e+00 : f32
    %27 = vector.broadcast %cst_26 : f32 to vector<8x10xf32>
    %cst_27 = arith.constant dense<0.000000e+00> : vector<8x128xf32>
    %28 = tpu.matmul %24, %2, %cst_27 {dimension_numbers = #tpu.dot_dimension_numbers<[1], [0], [0], [1], [0, 0, 1, 1], [], []>} : vector<8x32xf32>, vector<32x128xf32>, vector<8x128xf32> -> vector<8x128xf32>
    %29 = arith.addf %28, %7 : vector<8x128xf32>
    %c0_28 = arith.constant 0 : index
    %c0_29 = arith.constant 0 : index
    %c0_30 = arith.constant 0 : index
    %30 = vector.load %arg13[%c0_28, %c0_29, %c0_30] : memref<8x8x128xf32, #tpu.memory_space<vmem>>, vector<1x8x128xf32>
    %31 = vector.shape_cast %30 : vector<1x8x128xf32> to vector<8x128xf32>
    %cst_31 = arith.constant dense<0.000000e+00> : vector<8x128xf32>
    %32 = tpu.matmul %22, %0, %cst_31 {dimension_numbers = #tpu.dot_dimension_numbers<[1], [0], [0], [1], [0, 0, 1, 1], [], []>} : vector<8x32xf32>, vector<32x128xf32>, vector<8x128xf32> -> vector<8x128xf32>
    %33 = arith.addf %31, %32 : vector<8x128xf32>
    %34 = arith.negf %33 : vector<8x128xf32>
    %35 = math.exp %34 : vector<8x128xf32>
    %cst_32 = arith.constant 1.000000e+00 : f32
    %36 = vector.broadcast %cst_32 : f32 to vector<8x128xf32>
    %37 = arith.addf %36, %35 : vector<8x128xf32>
    %38 = arith.divf %36, %37 : vector<8x128xf32>
    %39 = vector.extract_strided_slice %38 {offsets = [0, 0], sizes = [8, 32], strides = [1, 1]} : vector<8x128xf32> to vector<8x32xf32>
    %40 = vector.extract_strided_slice %38 {offsets = [0, 32], sizes = [8, 32], strides = [1, 1]} : vector<8x128xf32> to vector<8x32xf32>
    %41 = vector.extract_strided_slice %38 {offsets = [0, 64], sizes = [8, 32], strides = [1, 1]} : vector<8x128xf32> to vector<8x32xf32>
    %cst_33 = arith.constant 2.000000e+00 : f32
    %42 = vector.broadcast %cst_33 : f32 to vector<8x32xf32>
    %43 = arith.mulf %42, %41 : vector<8x32xf32>
    %cst_34 = arith.constant 1.000000e+00 : f32
    %44 = vector.broadcast %cst_34 : f32 to vector<8x32xf32>
    %45 = arith.subf %43, %44 : vector<8x32xf32>
    %46 = vector.extract_strided_slice %38 {offsets = [0, 96], sizes = [8, 32], strides = [1, 1]} : vector<8x128xf32> to vector<8x32xf32>
    %47 = arith.mulf %40, %23 : vector<8x32xf32>
    %48 = arith.mulf %39, %45 : vector<8x32xf32>
    %49 = arith.addf %47, %48 : vector<8x32xf32>
    %50 = math.tanh %49 : vector<8x32xf32>
    %51 = arith.mulf %46, %50 : vector<8x32xf32>
    %cst_35 = arith.constant dense<0.000000e+00> : vector<8x128xf32>
    %52 = tpu.matmul %51, %1, %cst_35 {dimension_numbers = #tpu.dot_dimension_numbers<[1], [0], [0], [1], [0, 0, 1, 1], [], []>} : vector<8x32xf32>, vector<32x128xf32>, vector<8x128xf32> -> vector<8x128xf32>
    %53 = arith.addf %29, %52 : vector<8x128xf32>
    %54 = arith.negf %53 : vector<8x128xf32>
    %55 = math.exp %54 : vector<8x128xf32>
    %cst_36 = arith.constant 1.000000e+00 : f32
    %56 = vector.broadcast %cst_36 : f32 to vector<8x128xf32>
    %57 = arith.addf %56, %55 : vector<8x128xf32>
    %58 = arith.divf %56, %57 : vector<8x128xf32>
    %59 = vector.extract_strided_slice %58 {offsets = [0, 0], sizes = [8, 32], strides = [1, 1]} : vector<8x128xf32> to vector<8x32xf32>
    %60 = vector.extract_strided_slice %58 {offsets = [0, 32], sizes = [8, 32], strides = [1, 1]} : vector<8x128xf32> to vector<8x32xf32>
    %61 = vector.extract_strided_slice %58 {offsets = [0, 64], sizes = [8, 32], strides = [1, 1]} : vector<8x128xf32> to vector<8x32xf32>
    %cst_37 = arith.constant 2.000000e+00 : f32
    %62 = vector.broadcast %cst_37 : f32 to vector<8x32xf32>
    %63 = arith.mulf %62, %61 : vector<8x32xf32>
    %cst_38 = arith.constant 1.000000e+00 : f32
    %64 = vector.broadcast %cst_38 : f32 to vector<8x32xf32>
    %65 = arith.subf %63, %64 : vector<8x32xf32>
    %66 = vector.extract_strided_slice %58 {offsets = [0, 96], sizes = [8, 32], strides = [1, 1]} : vector<8x128xf32> to vector<8x32xf32>
    %67 = arith.mulf %60, %25 : vector<8x32xf32>
    %68 = arith.mulf %59, %65 : vector<8x32xf32>
    %69 = arith.addf %67, %68 : vector<8x32xf32>
    %70 = math.tanh %69 : vector<8x32xf32>
    %71 = arith.mulf %66, %70 : vector<8x32xf32>
    %72 = vector.broadcast %4 : vector<1x32xf32> to vector<8x32xf32>
    %73 = arith.mulf %71, %72 : vector<8x32xf32>
    %cst_39 = arith.constant dense<0.000000e+00> : vector<8xf32>
    %74 = vector.multi_reduction <add>, %73, %cst_39 [1] : vector<8x32xf32> to vector<8xf32>
    %75 = vector.shape_cast %74 : vector<8xf32> to vector<8x1xf32>
    %c0_i32 = arith.constant 0 : i32
    %76 = vector.broadcast %c0_i32 : i32 to vector<1x10xi32>
    %77 = arith.cmpi eq, %26, %76 : vector<1x10xi32>
    %78 = vector.shape_cast %77 : vector<1x10xi1> to vector<1x10xi1>
    %79 = vector.broadcast %78 : vector<1x10xi1> to vector<8x10xi1>
    %80 = vector.shape_cast %75 : vector<8x1xf32> to vector<8x1xf32>
    %81 = vector.broadcast %80 : vector<8x1xf32> to vector<8x10xf32>
    %82 = arith.select %79, %81, %27 : vector<8x10xi1>, vector<8x10xf32>
    %cst_40 = arith.constant dense<0.000000e+00> : vector<8x128xf32>
    %83 = tpu.matmul %71, %2, %cst_40 {dimension_numbers = #tpu.dot_dimension_numbers<[1], [0], [0], [1], [0, 0, 1, 1], [], []>} : vector<8x32xf32>, vector<32x128xf32>, vector<8x128xf32> -> vector<8x128xf32>
    %84 = arith.addf %83, %7 : vector<8x128xf32>
    %c1 = arith.constant 1 : index
    %c0_41 = arith.constant 0 : index
    %c0_42 = arith.constant 0 : index
    %85 = vector.load %arg13[%c1, %c0_41, %c0_42] : memref<8x8x128xf32, #tpu.memory_space<vmem>>, vector<1x8x128xf32>
    %86 = vector.shape_cast %85 : vector<1x8x128xf32> to vector<8x128xf32>
    %cst_43 = arith.constant dense<0.000000e+00> : vector<8x128xf32>
    %87 = tpu.matmul %51, %0, %cst_43 {dimension_numbers = #tpu.dot_dimension_numbers<[1], [0], [0], [1], [0, 0, 1, 1], [], []>} : vector<8x32xf32>, vector<32x128xf32>, vector<8x128xf32> -> vector<8x128xf32>
    %88 = arith.addf %86, %87 : vector<8x128xf32>
    %89 = arith.negf %88 : vector<8x128xf32>
    %90 = math.exp %89 : vector<8x128xf32>
    %cst_44 = arith.constant 1.000000e+00 : f32
    %91 = vector.broadcast %cst_44 : f32 to vector<8x128xf32>
    %92 = arith.addf %91, %90 : vector<8x128xf32>
    %93 = arith.divf %91, %92 : vector<8x128xf32>
    %94 = vector.extract_strided_slice %93 {offsets = [0, 0], sizes = [8, 32], strides = [1, 1]} : vector<8x128xf32> to vector<8x32xf32>
    %95 = vector.extract_strided_slice %93 {offsets = [0, 32], sizes = [8, 32], strides = [1, 1]} : vector<8x128xf32> to vector<8x32xf32>
    %96 = vector.extract_strided_slice %93 {offsets = [0, 64], sizes = [8, 32], strides = [1, 1]} : vector<8x128xf32> to vector<8x32xf32>
    %cst_45 = arith.constant 2.000000e+00 : f32
    %97 = vector.broadcast %cst_45 : f32 to vector<8x32xf32>
    %98 = arith.mulf %97, %96 : vector<8x32xf32>
    %cst_46 = arith.constant 1.000000e+00 : f32
    %99 = vector.broadcast %cst_46 : f32 to vector<8x32xf32>
    %100 = arith.subf %98, %99 : vector<8x32xf32>
    %101 = vector.extract_strided_slice %93 {offsets = [0, 96], sizes = [8, 32], strides = [1, 1]} : vector<8x128xf32> to vector<8x32xf32>
    %102 = arith.mulf %95, %49 : vector<8x32xf32>
    %103 = arith.mulf %94, %100 : vector<8x32xf32>
    %104 = arith.addf %102, %103 : vector<8x32xf32>
    %105 = math.tanh %104 : vector<8x32xf32>
    %106 = arith.mulf %101, %105 : vector<8x32xf32>
    %cst_47 = arith.constant dense<0.000000e+00> : vector<8x128xf32>
    %107 = tpu.matmul %106, %1, %cst_47 {dimension_numbers = #tpu.dot_dimension_numbers<[1], [0], [0], [1], [0, 0, 1, 1], [], []>} : vector<8x32xf32>, vector<32x128xf32>, vector<8x128xf32> -> vector<8x128xf32>
    %108 = arith.addf %84, %107 : vector<8x128xf32>
    %109 = arith.negf %108 : vector<8x128xf32>
    %110 = math.exp %109 : vector<8x128xf32>
    %cst_48 = arith.constant 1.000000e+00 : f32
    %111 = vector.broadcast %cst_48 : f32 to vector<8x128xf32>
    %112 = arith.addf %111, %110 : vector<8x128xf32>
    %113 = arith.divf %111, %112 : vector<8x128xf32>
    %114 = vector.extract_strided_slice %113 {offsets = [0, 0], sizes = [8, 32], strides = [1, 1]} : vector<8x128xf32> to vector<8x32xf32>
    %115 = vector.extract_strided_slice %113 {offsets = [0, 32], sizes = [8, 32], strides = [1, 1]} : vector<8x128xf32> to vector<8x32xf32>
    %116 = vector.extract_strided_slice %113 {offsets = [0, 64], sizes = [8, 32], strides = [1, 1]} : vector<8x128xf32> to vector<8x32xf32>
    %cst_49 = arith.constant 2.000000e+00 : f32
    %117 = vector.broadcast %cst_49 : f32 to vector<8x32xf32>
    %118 = arith.mulf %117, %116 : vector<8x32xf32>
    %cst_50 = arith.constant 1.000000e+00 : f32
    %119 = vector.broadcast %cst_50 : f32 to vector<8x32xf32>
    %120 = arith.subf %118, %119 : vector<8x32xf32>
    %121 = vector.extract_strided_slice %113 {offsets = [0, 96], sizes = [8, 32], strides = [1, 1]} : vector<8x128xf32> to vector<8x32xf32>
    %122 = arith.mulf %115, %69 : vector<8x32xf32>
    %123 = arith.mulf %114, %120 : vector<8x32xf32>
    %124 = arith.addf %122, %123 : vector<8x32xf32>
    %125 = math.tanh %124 : vector<8x32xf32>
    %126 = arith.mulf %121, %125 : vector<8x32xf32>
    %127 = vector.broadcast %4 : vector<1x32xf32> to vector<8x32xf32>
    %128 = arith.mulf %126, %127 : vector<8x32xf32>
    %cst_51 = arith.constant dense<0.000000e+00> : vector<8xf32>
    %129 = vector.multi_reduction <add>, %128, %cst_51 [1] : vector<8x32xf32> to vector<8xf32>
    %130 = vector.shape_cast %129 : vector<8xf32> to vector<8x1xf32>
    %c1_i32 = arith.constant 1 : i32
    %131 = vector.broadcast %c1_i32 : i32 to vector<1x10xi32>
    %132 = arith.cmpi eq, %26, %131 : vector<1x10xi32>
    %133 = vector.shape_cast %132 : vector<1x10xi1> to vector<1x10xi1>
    %134 = vector.broadcast %133 : vector<1x10xi1> to vector<8x10xi1>
    %135 = vector.shape_cast %130 : vector<8x1xf32> to vector<8x1xf32>
    %136 = vector.broadcast %135 : vector<8x1xf32> to vector<8x10xf32>
    %137 = arith.select %134, %136, %82 : vector<8x10xi1>, vector<8x10xf32>
    %cst_52 = arith.constant dense<0.000000e+00> : vector<8x128xf32>
    %138 = tpu.matmul %126, %2, %cst_52 {dimension_numbers = #tpu.dot_dimension_numbers<[1], [0], [0], [1], [0, 0, 1, 1], [], []>} : vector<8x32xf32>, vector<32x128xf32>, vector<8x128xf32> -> vector<8x128xf32>
    %139 = arith.addf %138, %7 : vector<8x128xf32>
    %c2 = arith.constant 2 : index
    %c0_53 = arith.constant 0 : index
    %c0_54 = arith.constant 0 : index
    %140 = vector.load %arg13[%c2, %c0_53, %c0_54] : memref<8x8x128xf32, #tpu.memory_space<vmem>>, vector<1x8x128xf32>
    %141 = vector.shape_cast %140 : vector<1x8x128xf32> to vector<8x128xf32>
    %cst_55 = arith.constant dense<0.000000e+00> : vector<8x128xf32>
    %142 = tpu.matmul %106, %0, %cst_55 {dimension_numbers = #tpu.dot_dimension_numbers<[1], [0], [0], [1], [0, 0, 1, 1], [], []>} : vector<8x32xf32>, vector<32x128xf32>, vector<8x128xf32> -> vector<8x128xf32>
    %143 = arith.addf %141, %142 : vector<8x128xf32>
    %144 = arith.negf %143 : vector<8x128xf32>
    %145 = math.exp %144 : vector<8x128xf32>
    %cst_56 = arith.constant 1.000000e+00 : f32
    %146 = vector.broadcast %cst_56 : f32 to vector<8x128xf32>
    %147 = arith.addf %146, %145 : vector<8x128xf32>
    %148 = arith.divf %146, %147 : vector<8x128xf32>
    %149 = vector.extract_strided_slice %148 {offsets = [0, 0], sizes = [8, 32], strides = [1, 1]} : vector<8x128xf32> to vector<8x32xf32>
    %150 = vector.extract_strided_slice %148 {offsets = [0, 32], sizes = [8, 32], strides = [1, 1]} : vector<8x128xf32> to vector<8x32xf32>
    %151 = vector.extract_strided_slice %148 {offsets = [0, 64], sizes = [8, 32], strides = [1, 1]} : vector<8x128xf32> to vector<8x32xf32>
    %cst_57 = arith.constant 2.000000e+00 : f32
    %152 = vector.broadcast %cst_57 : f32 to vector<8x32xf32>
    %153 = arith.mulf %152, %151 : vector<8x32xf32>
    %cst_58 = arith.constant 1.000000e+00 : f32
    %154 = vector.broadcast %cst_58 : f32 to vector<8x32xf32>
    %155 = arith.subf %153, %154 : vector<8x32xf32>
    %156 = vector.extract_strided_slice %148 {offsets = [0, 96], sizes = [8, 32], strides = [1, 1]} : vector<8x128xf32> to vector<8x32xf32>
    %157 = arith.mulf %150, %104 : vector<8x32xf32>
    %158 = arith.mulf %149, %155 : vector<8x32xf32>
    %159 = arith.addf %157, %158 : vector<8x32xf32>
    %160 = math.tanh %159 : vector<8x32xf32>
    %161 = arith.mulf %156, %160 : vector<8x32xf32>
    %cst_59 = arith.constant dense<0.000000e+00> : vector<8x128xf32>
    %162 = tpu.matmul %161, %1, %cst_59 {dimension_numbers = #tpu.dot_dimension_numbers<[1], [0], [0], [1], [0, 0, 1, 1], [], []>} : vector<8x32xf32>, vector<32x128xf32>, vector<8x128xf32> -> vector<8x128xf32>
    %163 = arith.addf %139, %162 : vector<8x128xf32>
    %164 = arith.negf %163 : vector<8x128xf32>
    %165 = math.exp %164 : vector<8x128xf32>
    %cst_60 = arith.constant 1.000000e+00 : f32
    %166 = vector.broadcast %cst_60 : f32 to vector<8x128xf32>
    %167 = arith.addf %166, %165 : vector<8x128xf32>
    %168 = arith.divf %166, %167 : vector<8x128xf32>
    %169 = vector.extract_strided_slice %168 {offsets = [0, 0], sizes = [8, 32], strides = [1, 1]} : vector<8x128xf32> to vector<8x32xf32>
    %170 = vector.extract_strided_slice %168 {offsets = [0, 32], sizes = [8, 32], strides = [1, 1]} : vector<8x128xf32> to vector<8x32xf32>
    %171 = vector.extract_strided_slice %168 {offsets = [0, 64], sizes = [8, 32], strides = [1, 1]} : vector<8x128xf32> to vector<8x32xf32>
    %cst_61 = arith.constant 2.000000e+00 : f32
    %172 = vector.broadcast %cst_61 : f32 to vector<8x32xf32>
    %173 = arith.mulf %172, %171 : vector<8x32xf32>
    %cst_62 = arith.constant 1.000000e+00 : f32
    %174 = vector.broadcast %cst_62 : f32 to vector<8x32xf32>
    %175 = arith.subf %173, %174 : vector<8x32xf32>
    %176 = vector.extract_strided_slice %168 {offsets = [0, 96], sizes = [8, 32], strides = [1, 1]} : vector<8x128xf32> to vector<8x32xf32>
    %177 = arith.mulf %170, %124 : vector<8x32xf32>
    %178 = arith.mulf %169, %175 : vector<8x32xf32>
    %179 = arith.addf %177, %178 : vector<8x32xf32>
    %180 = math.tanh %179 : vector<8x32xf32>
    %181 = arith.mulf %176, %180 : vector<8x32xf32>
    %182 = vector.broadcast %4 : vector<1x32xf32> to vector<8x32xf32>
    %183 = arith.mulf %181, %182 : vector<8x32xf32>
    %cst_63 = arith.constant dense<0.000000e+00> : vector<8xf32>
    %184 = vector.multi_reduction <add>, %183, %cst_63 [1] : vector<8x32xf32> to vector<8xf32>
    %185 = vector.shape_cast %184 : vector<8xf32> to vector<8x1xf32>
    %c2_i32 = arith.constant 2 : i32
    %186 = vector.broadcast %c2_i32 : i32 to vector<1x10xi32>
    %187 = arith.cmpi eq, %26, %186 : vector<1x10xi32>
    %188 = vector.shape_cast %187 : vector<1x10xi1> to vector<1x10xi1>
    %189 = vector.broadcast %188 : vector<1x10xi1> to vector<8x10xi1>
    %190 = vector.shape_cast %185 : vector<8x1xf32> to vector<8x1xf32>
    %191 = vector.broadcast %190 : vector<8x1xf32> to vector<8x10xf32>
    %192 = arith.select %189, %191, %137 : vector<8x10xi1>, vector<8x10xf32>
    %cst_64 = arith.constant dense<0.000000e+00> : vector<8x128xf32>
    %193 = tpu.matmul %181, %2, %cst_64 {dimension_numbers = #tpu.dot_dimension_numbers<[1], [0], [0], [1], [0, 0, 1, 1], [], []>} : vector<8x32xf32>, vector<32x128xf32>, vector<8x128xf32> -> vector<8x128xf32>
    %194 = arith.addf %193, %7 : vector<8x128xf32>
    %c3 = arith.constant 3 : index
    %c0_65 = arith.constant 0 : index
    %c0_66 = arith.constant 0 : index
    %195 = vector.load %arg13[%c3, %c0_65, %c0_66] : memref<8x8x128xf32, #tpu.memory_space<vmem>>, vector<1x8x128xf32>
    %196 = vector.shape_cast %195 : vector<1x8x128xf32> to vector<8x128xf32>
    %cst_67 = arith.constant dense<0.000000e+00> : vector<8x128xf32>
    %197 = tpu.matmul %161, %0, %cst_67 {dimension_numbers = #tpu.dot_dimension_numbers<[1], [0], [0], [1], [0, 0, 1, 1], [], []>} : vector<8x32xf32>, vector<32x128xf32>, vector<8x128xf32> -> vector<8x128xf32>
    %198 = arith.addf %196, %197 : vector<8x128xf32>
    %199 = arith.negf %198 : vector<8x128xf32>
    %200 = math.exp %199 : vector<8x128xf32>
    %cst_68 = arith.constant 1.000000e+00 : f32
    %201 = vector.broadcast %cst_68 : f32 to vector<8x128xf32>
    %202 = arith.addf %201, %200 : vector<8x128xf32>
    %203 = arith.divf %201, %202 : vector<8x128xf32>
    %204 = vector.extract_strided_slice %203 {offsets = [0, 0], sizes = [8, 32], strides = [1, 1]} : vector<8x128xf32> to vector<8x32xf32>
    %205 = vector.extract_strided_slice %203 {offsets = [0, 32], sizes = [8, 32], strides = [1, 1]} : vector<8x128xf32> to vector<8x32xf32>
    %206 = vector.extract_strided_slice %203 {offsets = [0, 64], sizes = [8, 32], strides = [1, 1]} : vector<8x128xf32> to vector<8x32xf32>
    %cst_69 = arith.constant 2.000000e+00 : f32
    %207 = vector.broadcast %cst_69 : f32 to vector<8x32xf32>
    %208 = arith.mulf %207, %206 : vector<8x32xf32>
    %cst_70 = arith.constant 1.000000e+00 : f32
    %209 = vector.broadcast %cst_70 : f32 to vector<8x32xf32>
    %210 = arith.subf %208, %209 : vector<8x32xf32>
    %211 = vector.extract_strided_slice %203 {offsets = [0, 96], sizes = [8, 32], strides = [1, 1]} : vector<8x128xf32> to vector<8x32xf32>
    %212 = arith.mulf %205, %159 : vector<8x32xf32>
    %213 = arith.mulf %204, %210 : vector<8x32xf32>
    %214 = arith.addf %212, %213 : vector<8x32xf32>
    %215 = math.tanh %214 : vector<8x32xf32>
    %216 = arith.mulf %211, %215 : vector<8x32xf32>
    %cst_71 = arith.constant dense<0.000000e+00> : vector<8x128xf32>
    %217 = tpu.matmul %216, %1, %cst_71 {dimension_numbers = #tpu.dot_dimension_numbers<[1], [0], [0], [1], [0, 0, 1, 1], [], []>} : vector<8x32xf32>, vector<32x128xf32>, vector<8x128xf32> -> vector<8x128xf32>
    %218 = arith.addf %194, %217 : vector<8x128xf32>
    %219 = arith.negf %218 : vector<8x128xf32>
    %220 = math.exp %219 : vector<8x128xf32>
    %cst_72 = arith.constant 1.000000e+00 : f32
    %221 = vector.broadcast %cst_72 : f32 to vector<8x128xf32>
    %222 = arith.addf %221, %220 : vector<8x128xf32>
    %223 = arith.divf %221, %222 : vector<8x128xf32>
    %224 = vector.extract_strided_slice %223 {offsets = [0, 0], sizes = [8, 32], strides = [1, 1]} : vector<8x128xf32> to vector<8x32xf32>
    %225 = vector.extract_strided_slice %223 {offsets = [0, 32], sizes = [8, 32], strides = [1, 1]} : vector<8x128xf32> to vector<8x32xf32>
    %226 = vector.extract_strided_slice %223 {offsets = [0, 64], sizes = [8, 32], strides = [1, 1]} : vector<8x128xf32> to vector<8x32xf32>
    %cst_73 = arith.constant 2.000000e+00 : f32
    %227 = vector.broadcast %cst_73 : f32 to vector<8x32xf32>
    %228 = arith.mulf %227, %226 : vector<8x32xf32>
    %cst_74 = arith.constant 1.000000e+00 : f32
    %229 = vector.broadcast %cst_74 : f32 to vector<8x32xf32>
    %230 = arith.subf %228, %229 : vector<8x32xf32>
    %231 = vector.extract_strided_slice %223 {offsets = [0, 96], sizes = [8, 32], strides = [1, 1]} : vector<8x128xf32> to vector<8x32xf32>
    %232 = arith.mulf %225, %179 : vector<8x32xf32>
    %233 = arith.mulf %224, %230 : vector<8x32xf32>
    %234 = arith.addf %232, %233 : vector<8x32xf32>
    %235 = math.tanh %234 : vector<8x32xf32>
    %236 = arith.mulf %231, %235 : vector<8x32xf32>
    %237 = vector.broadcast %4 : vector<1x32xf32> to vector<8x32xf32>
    %238 = arith.mulf %236, %237 : vector<8x32xf32>
    %cst_75 = arith.constant dense<0.000000e+00> : vector<8xf32>
    %239 = vector.multi_reduction <add>, %238, %cst_75 [1] : vector<8x32xf32> to vector<8xf32>
    %240 = vector.shape_cast %239 : vector<8xf32> to vector<8x1xf32>
    %c3_i32 = arith.constant 3 : i32
    %241 = vector.broadcast %c3_i32 : i32 to vector<1x10xi32>
    %242 = arith.cmpi eq, %26, %241 : vector<1x10xi32>
    %243 = vector.shape_cast %242 : vector<1x10xi1> to vector<1x10xi1>
    %244 = vector.broadcast %243 : vector<1x10xi1> to vector<8x10xi1>
    %245 = vector.shape_cast %240 : vector<8x1xf32> to vector<8x1xf32>
    %246 = vector.broadcast %245 : vector<8x1xf32> to vector<8x10xf32>
    %247 = arith.select %244, %246, %192 : vector<8x10xi1>, vector<8x10xf32>
    %cst_76 = arith.constant dense<0.000000e+00> : vector<8x128xf32>
    %248 = tpu.matmul %236, %2, %cst_76 {dimension_numbers = #tpu.dot_dimension_numbers<[1], [0], [0], [1], [0, 0, 1, 1], [], []>} : vector<8x32xf32>, vector<32x128xf32>, vector<8x128xf32> -> vector<8x128xf32>
    %249 = arith.addf %248, %7 : vector<8x128xf32>
    %c4 = arith.constant 4 : index
    %c0_77 = arith.constant 0 : index
    %c0_78 = arith.constant 0 : index
    %250 = vector.load %arg13[%c4, %c0_77, %c0_78] : memref<8x8x128xf32, #tpu.memory_space<vmem>>, vector<1x8x128xf32>
    %251 = vector.shape_cast %250 : vector<1x8x128xf32> to vector<8x128xf32>
    %cst_79 = arith.constant dense<0.000000e+00> : vector<8x128xf32>
    %252 = tpu.matmul %216, %0, %cst_79 {dimension_numbers = #tpu.dot_dimension_numbers<[1], [0], [0], [1], [0, 0, 1, 1], [], []>} : vector<8x32xf32>, vector<32x128xf32>, vector<8x128xf32> -> vector<8x128xf32>
    %253 = arith.addf %251, %252 : vector<8x128xf32>
    %254 = arith.negf %253 : vector<8x128xf32>
    %255 = math.exp %254 : vector<8x128xf32>
    %cst_80 = arith.constant 1.000000e+00 : f32
    %256 = vector.broadcast %cst_80 : f32 to vector<8x128xf32>
    %257 = arith.addf %256, %255 : vector<8x128xf32>
    %258 = arith.divf %256, %257 : vector<8x128xf32>
    %259 = vector.extract_strided_slice %258 {offsets = [0, 0], sizes = [8, 32], strides = [1, 1]} : vector<8x128xf32> to vector<8x32xf32>
    %260 = vector.extract_strided_slice %258 {offsets = [0, 32], sizes = [8, 32], strides = [1, 1]} : vector<8x128xf32> to vector<8x32xf32>
    %261 = vector.extract_strided_slice %258 {offsets = [0, 64], sizes = [8, 32], strides = [1, 1]} : vector<8x128xf32> to vector<8x32xf32>
    %cst_81 = arith.constant 2.000000e+00 : f32
    %262 = vector.broadcast %cst_81 : f32 to vector<8x32xf32>
    %263 = arith.mulf %262, %261 : vector<8x32xf32>
    %cst_82 = arith.constant 1.000000e+00 : f32
    %264 = vector.broadcast %cst_82 : f32 to vector<8x32xf32>
    %265 = arith.subf %263, %264 : vector<8x32xf32>
    %266 = vector.extract_strided_slice %258 {offsets = [0, 96], sizes = [8, 32], strides = [1, 1]} : vector<8x128xf32> to vector<8x32xf32>
    %267 = arith.mulf %260, %214 : vector<8x32xf32>
    %268 = arith.mulf %259, %265 : vector<8x32xf32>
    %269 = arith.addf %267, %268 : vector<8x32xf32>
    %270 = math.tanh %269 : vector<8x32xf32>
    %271 = arith.mulf %266, %270 : vector<8x32xf32>
    %cst_83 = arith.constant dense<0.000000e+00> : vector<8x128xf32>
    %272 = tpu.matmul %271, %1, %cst_83 {dimension_numbers = #tpu.dot_dimension_numbers<[1], [0], [0], [1], [0, 0, 1, 1], [], []>} : vector<8x32xf32>, vector<32x128xf32>, vector<8x128xf32> -> vector<8x128xf32>
    %273 = arith.addf %249, %272 : vector<8x128xf32>
    %274 = arith.negf %273 : vector<8x128xf32>
    %275 = math.exp %274 : vector<8x128xf32>
    %cst_84 = arith.constant 1.000000e+00 : f32
    %276 = vector.broadcast %cst_84 : f32 to vector<8x128xf32>
    %277 = arith.addf %276, %275 : vector<8x128xf32>
    %278 = arith.divf %276, %277 : vector<8x128xf32>
    %279 = vector.extract_strided_slice %278 {offsets = [0, 0], sizes = [8, 32], strides = [1, 1]} : vector<8x128xf32> to vector<8x32xf32>
    %280 = vector.extract_strided_slice %278 {offsets = [0, 32], sizes = [8, 32], strides = [1, 1]} : vector<8x128xf32> to vector<8x32xf32>
    %281 = vector.extract_strided_slice %278 {offsets = [0, 64], sizes = [8, 32], strides = [1, 1]} : vector<8x128xf32> to vector<8x32xf32>
    %cst_85 = arith.constant 2.000000e+00 : f32
    %282 = vector.broadcast %cst_85 : f32 to vector<8x32xf32>
    %283 = arith.mulf %282, %281 : vector<8x32xf32>
    %cst_86 = arith.constant 1.000000e+00 : f32
    %284 = vector.broadcast %cst_86 : f32 to vector<8x32xf32>
    %285 = arith.subf %283, %284 : vector<8x32xf32>
    %286 = vector.extract_strided_slice %278 {offsets = [0, 96], sizes = [8, 32], strides = [1, 1]} : vector<8x128xf32> to vector<8x32xf32>
    %287 = arith.mulf %280, %234 : vector<8x32xf32>
    %288 = arith.mulf %279, %285 : vector<8x32xf32>
    %289 = arith.addf %287, %288 : vector<8x32xf32>
    %290 = math.tanh %289 : vector<8x32xf32>
    %291 = arith.mulf %286, %290 : vector<8x32xf32>
    %292 = vector.broadcast %4 : vector<1x32xf32> to vector<8x32xf32>
    %293 = arith.mulf %291, %292 : vector<8x32xf32>
    %cst_87 = arith.constant dense<0.000000e+00> : vector<8xf32>
    %294 = vector.multi_reduction <add>, %293, %cst_87 [1] : vector<8x32xf32> to vector<8xf32>
    %295 = vector.shape_cast %294 : vector<8xf32> to vector<8x1xf32>
    %c4_i32 = arith.constant 4 : i32
    %296 = vector.broadcast %c4_i32 : i32 to vector<1x10xi32>
    %297 = arith.cmpi eq, %26, %296 : vector<1x10xi32>
    %298 = vector.shape_cast %297 : vector<1x10xi1> to vector<1x10xi1>
    %299 = vector.broadcast %298 : vector<1x10xi1> to vector<8x10xi1>
    %300 = vector.shape_cast %295 : vector<8x1xf32> to vector<8x1xf32>
    %301 = vector.broadcast %300 : vector<8x1xf32> to vector<8x10xf32>
    %302 = arith.select %299, %301, %247 : vector<8x10xi1>, vector<8x10xf32>
    %cst_88 = arith.constant dense<0.000000e+00> : vector<8x128xf32>
    %303 = tpu.matmul %291, %2, %cst_88 {dimension_numbers = #tpu.dot_dimension_numbers<[1], [0], [0], [1], [0, 0, 1, 1], [], []>} : vector<8x32xf32>, vector<32x128xf32>, vector<8x128xf32> -> vector<8x128xf32>
    %304 = arith.addf %303, %7 : vector<8x128xf32>
    %c5 = arith.constant 5 : index
    %c0_89 = arith.constant 0 : index
    %c0_90 = arith.constant 0 : index
    %305 = vector.load %arg13[%c5, %c0_89, %c0_90] : memref<8x8x128xf32, #tpu.memory_space<vmem>>, vector<1x8x128xf32>
    %306 = vector.shape_cast %305 : vector<1x8x128xf32> to vector<8x128xf32>
    %cst_91 = arith.constant dense<0.000000e+00> : vector<8x128xf32>
    %307 = tpu.matmul %271, %0, %cst_91 {dimension_numbers = #tpu.dot_dimension_numbers<[1], [0], [0], [1], [0, 0, 1, 1], [], []>} : vector<8x32xf32>, vector<32x128xf32>, vector<8x128xf32> -> vector<8x128xf32>
    %308 = arith.addf %306, %307 : vector<8x128xf32>
    %309 = arith.negf %308 : vector<8x128xf32>
    %310 = math.exp %309 : vector<8x128xf32>
    %cst_92 = arith.constant 1.000000e+00 : f32
    %311 = vector.broadcast %cst_92 : f32 to vector<8x128xf32>
    %312 = arith.addf %311, %310 : vector<8x128xf32>
    %313 = arith.divf %311, %312 : vector<8x128xf32>
    %314 = vector.extract_strided_slice %313 {offsets = [0, 0], sizes = [8, 32], strides = [1, 1]} : vector<8x128xf32> to vector<8x32xf32>
    %315 = vector.extract_strided_slice %313 {offsets = [0, 32], sizes = [8, 32], strides = [1, 1]} : vector<8x128xf32> to vector<8x32xf32>
    %316 = vector.extract_strided_slice %313 {offsets = [0, 64], sizes = [8, 32], strides = [1, 1]} : vector<8x128xf32> to vector<8x32xf32>
    %cst_93 = arith.constant 2.000000e+00 : f32
    %317 = vector.broadcast %cst_93 : f32 to vector<8x32xf32>
    %318 = arith.mulf %317, %316 : vector<8x32xf32>
    %cst_94 = arith.constant 1.000000e+00 : f32
    %319 = vector.broadcast %cst_94 : f32 to vector<8x32xf32>
    %320 = arith.subf %318, %319 : vector<8x32xf32>
    %321 = vector.extract_strided_slice %313 {offsets = [0, 96], sizes = [8, 32], strides = [1, 1]} : vector<8x128xf32> to vector<8x32xf32>
    %322 = arith.mulf %315, %269 : vector<8x32xf32>
    %323 = arith.mulf %314, %320 : vector<8x32xf32>
    %324 = arith.addf %322, %323 : vector<8x32xf32>
    %325 = math.tanh %324 : vector<8x32xf32>
    %326 = arith.mulf %321, %325 : vector<8x32xf32>
    %cst_95 = arith.constant dense<0.000000e+00> : vector<8x128xf32>
    %327 = tpu.matmul %326, %1, %cst_95 {dimension_numbers = #tpu.dot_dimension_numbers<[1], [0], [0], [1], [0, 0, 1, 1], [], []>} : vector<8x32xf32>, vector<32x128xf32>, vector<8x128xf32> -> vector<8x128xf32>
    %328 = arith.addf %304, %327 : vector<8x128xf32>
    %329 = arith.negf %328 : vector<8x128xf32>
    %330 = math.exp %329 : vector<8x128xf32>
    %cst_96 = arith.constant 1.000000e+00 : f32
    %331 = vector.broadcast %cst_96 : f32 to vector<8x128xf32>
    %332 = arith.addf %331, %330 : vector<8x128xf32>
    %333 = arith.divf %331, %332 : vector<8x128xf32>
    %334 = vector.extract_strided_slice %333 {offsets = [0, 0], sizes = [8, 32], strides = [1, 1]} : vector<8x128xf32> to vector<8x32xf32>
    %335 = vector.extract_strided_slice %333 {offsets = [0, 32], sizes = [8, 32], strides = [1, 1]} : vector<8x128xf32> to vector<8x32xf32>
    %336 = vector.extract_strided_slice %333 {offsets = [0, 64], sizes = [8, 32], strides = [1, 1]} : vector<8x128xf32> to vector<8x32xf32>
    %cst_97 = arith.constant 2.000000e+00 : f32
    %337 = vector.broadcast %cst_97 : f32 to vector<8x32xf32>
    %338 = arith.mulf %337, %336 : vector<8x32xf32>
    %cst_98 = arith.constant 1.000000e+00 : f32
    %339 = vector.broadcast %cst_98 : f32 to vector<8x32xf32>
    %340 = arith.subf %338, %339 : vector<8x32xf32>
    %341 = vector.extract_strided_slice %333 {offsets = [0, 96], sizes = [8, 32], strides = [1, 1]} : vector<8x128xf32> to vector<8x32xf32>
    %342 = arith.mulf %335, %289 : vector<8x32xf32>
    %343 = arith.mulf %334, %340 : vector<8x32xf32>
    %344 = arith.addf %342, %343 : vector<8x32xf32>
    %345 = math.tanh %344 : vector<8x32xf32>
    %346 = arith.mulf %341, %345 : vector<8x32xf32>
    %347 = vector.broadcast %4 : vector<1x32xf32> to vector<8x32xf32>
    %348 = arith.mulf %346, %347 : vector<8x32xf32>
    %cst_99 = arith.constant dense<0.000000e+00> : vector<8xf32>
    %349 = vector.multi_reduction <add>, %348, %cst_99 [1] : vector<8x32xf32> to vector<8xf32>
    %350 = vector.shape_cast %349 : vector<8xf32> to vector<8x1xf32>
    %c5_i32 = arith.constant 5 : i32
    %351 = vector.broadcast %c5_i32 : i32 to vector<1x10xi32>
    %352 = arith.cmpi eq, %26, %351 : vector<1x10xi32>
    %353 = vector.shape_cast %352 : vector<1x10xi1> to vector<1x10xi1>
    %354 = vector.broadcast %353 : vector<1x10xi1> to vector<8x10xi1>
    %355 = vector.shape_cast %350 : vector<8x1xf32> to vector<8x1xf32>
    %356 = vector.broadcast %355 : vector<8x1xf32> to vector<8x10xf32>
    %357 = arith.select %354, %356, %302 : vector<8x10xi1>, vector<8x10xf32>
    %cst_100 = arith.constant dense<0.000000e+00> : vector<8x128xf32>
    %358 = tpu.matmul %346, %2, %cst_100 {dimension_numbers = #tpu.dot_dimension_numbers<[1], [0], [0], [1], [0, 0, 1, 1], [], []>} : vector<8x32xf32>, vector<32x128xf32>, vector<8x128xf32> -> vector<8x128xf32>
    %359 = arith.addf %358, %7 : vector<8x128xf32>
    %c6 = arith.constant 6 : index
    %c0_101 = arith.constant 0 : index
    %c0_102 = arith.constant 0 : index
    %360 = vector.load %arg13[%c6, %c0_101, %c0_102] : memref<8x8x128xf32, #tpu.memory_space<vmem>>, vector<1x8x128xf32>
    %361 = vector.shape_cast %360 : vector<1x8x128xf32> to vector<8x128xf32>
    %cst_103 = arith.constant dense<0.000000e+00> : vector<8x128xf32>
    %362 = tpu.matmul %326, %0, %cst_103 {dimension_numbers = #tpu.dot_dimension_numbers<[1], [0], [0], [1], [0, 0, 1, 1], [], []>} : vector<8x32xf32>, vector<32x128xf32>, vector<8x128xf32> -> vector<8x128xf32>
    %363 = arith.addf %361, %362 : vector<8x128xf32>
    %364 = arith.negf %363 : vector<8x128xf32>
    %365 = math.exp %364 : vector<8x128xf32>
    %cst_104 = arith.constant 1.000000e+00 : f32
    %366 = vector.broadcast %cst_104 : f32 to vector<8x128xf32>
    %367 = arith.addf %366, %365 : vector<8x128xf32>
    %368 = arith.divf %366, %367 : vector<8x128xf32>
    %369 = vector.extract_strided_slice %368 {offsets = [0, 0], sizes = [8, 32], strides = [1, 1]} : vector<8x128xf32> to vector<8x32xf32>
    %370 = vector.extract_strided_slice %368 {offsets = [0, 32], sizes = [8, 32], strides = [1, 1]} : vector<8x128xf32> to vector<8x32xf32>
    %371 = vector.extract_strided_slice %368 {offsets = [0, 64], sizes = [8, 32], strides = [1, 1]} : vector<8x128xf32> to vector<8x32xf32>
    %cst_105 = arith.constant 2.000000e+00 : f32
    %372 = vector.broadcast %cst_105 : f32 to vector<8x32xf32>
    %373 = arith.mulf %372, %371 : vector<8x32xf32>
    %cst_106 = arith.constant 1.000000e+00 : f32
    %374 = vector.broadcast %cst_106 : f32 to vector<8x32xf32>
    %375 = arith.subf %373, %374 : vector<8x32xf32>
    %376 = vector.extract_strided_slice %368 {offsets = [0, 96], sizes = [8, 32], strides = [1, 1]} : vector<8x128xf32> to vector<8x32xf32>
    %377 = arith.mulf %370, %324 : vector<8x32xf32>
    %378 = arith.mulf %369, %375 : vector<8x32xf32>
    %379 = arith.addf %377, %378 : vector<8x32xf32>
    %380 = math.tanh %379 : vector<8x32xf32>
    %381 = arith.mulf %376, %380 : vector<8x32xf32>
    %cst_107 = arith.constant dense<0.000000e+00> : vector<8x128xf32>
    %382 = tpu.matmul %381, %1, %cst_107 {dimension_numbers = #tpu.dot_dimension_numbers<[1], [0], [0], [1], [0, 0, 1, 1], [], []>} : vector<8x32xf32>, vector<32x128xf32>, vector<8x128xf32> -> vector<8x128xf32>
    %383 = arith.addf %359, %382 : vector<8x128xf32>
    %384 = arith.negf %383 : vector<8x128xf32>
    %385 = math.exp %384 : vector<8x128xf32>
    %cst_108 = arith.constant 1.000000e+00 : f32
    %386 = vector.broadcast %cst_108 : f32 to vector<8x128xf32>
    %387 = arith.addf %386, %385 : vector<8x128xf32>
    %388 = arith.divf %386, %387 : vector<8x128xf32>
    %389 = vector.extract_strided_slice %388 {offsets = [0, 0], sizes = [8, 32], strides = [1, 1]} : vector<8x128xf32> to vector<8x32xf32>
    %390 = vector.extract_strided_slice %388 {offsets = [0, 32], sizes = [8, 32], strides = [1, 1]} : vector<8x128xf32> to vector<8x32xf32>
    %391 = vector.extract_strided_slice %388 {offsets = [0, 64], sizes = [8, 32], strides = [1, 1]} : vector<8x128xf32> to vector<8x32xf32>
    %cst_109 = arith.constant 2.000000e+00 : f32
    %392 = vector.broadcast %cst_109 : f32 to vector<8x32xf32>
    %393 = arith.mulf %392, %391 : vector<8x32xf32>
    %cst_110 = arith.constant 1.000000e+00 : f32
    %394 = vector.broadcast %cst_110 : f32 to vector<8x32xf32>
    %395 = arith.subf %393, %394 : vector<8x32xf32>
    %396 = vector.extract_strided_slice %388 {offsets = [0, 96], sizes = [8, 32], strides = [1, 1]} : vector<8x128xf32> to vector<8x32xf32>
    %397 = arith.mulf %390, %344 : vector<8x32xf32>
    %398 = arith.mulf %389, %395 : vector<8x32xf32>
    %399 = arith.addf %397, %398 : vector<8x32xf32>
    %400 = math.tanh %399 : vector<8x32xf32>
    %401 = arith.mulf %396, %400 : vector<8x32xf32>
    %402 = vector.broadcast %4 : vector<1x32xf32> to vector<8x32xf32>
    %403 = arith.mulf %401, %402 : vector<8x32xf32>
    %cst_111 = arith.constant dense<0.000000e+00> : vector<8xf32>
    %404 = vector.multi_reduction <add>, %403, %cst_111 [1] : vector<8x32xf32> to vector<8xf32>
    %405 = vector.shape_cast %404 : vector<8xf32> to vector<8x1xf32>
    %c6_i32 = arith.constant 6 : i32
    %406 = vector.broadcast %c6_i32 : i32 to vector<1x10xi32>
    %407 = arith.cmpi eq, %26, %406 : vector<1x10xi32>
    %408 = vector.shape_cast %407 : vector<1x10xi1> to vector<1x10xi1>
    %409 = vector.broadcast %408 : vector<1x10xi1> to vector<8x10xi1>
    %410 = vector.shape_cast %405 : vector<8x1xf32> to vector<8x1xf32>
    %411 = vector.broadcast %410 : vector<8x1xf32> to vector<8x10xf32>
    %412 = arith.select %409, %411, %357 : vector<8x10xi1>, vector<8x10xf32>
    %cst_112 = arith.constant dense<0.000000e+00> : vector<8x128xf32>
    %413 = tpu.matmul %401, %2, %cst_112 {dimension_numbers = #tpu.dot_dimension_numbers<[1], [0], [0], [1], [0, 0, 1, 1], [], []>} : vector<8x32xf32>, vector<32x128xf32>, vector<8x128xf32> -> vector<8x128xf32>
    %414 = arith.addf %413, %7 : vector<8x128xf32>
    %c7 = arith.constant 7 : index
    %c0_113 = arith.constant 0 : index
    %c0_114 = arith.constant 0 : index
    %415 = vector.load %arg13[%c7, %c0_113, %c0_114] : memref<8x8x128xf32, #tpu.memory_space<vmem>>, vector<1x8x128xf32>
    %416 = vector.shape_cast %415 : vector<1x8x128xf32> to vector<8x128xf32>
    %cst_115 = arith.constant dense<0.000000e+00> : vector<8x128xf32>
    %417 = tpu.matmul %381, %0, %cst_115 {dimension_numbers = #tpu.dot_dimension_numbers<[1], [0], [0], [1], [0, 0, 1, 1], [], []>} : vector<8x32xf32>, vector<32x128xf32>, vector<8x128xf32> -> vector<8x128xf32>
    %418 = arith.addf %416, %417 : vector<8x128xf32>
    %419 = arith.negf %418 : vector<8x128xf32>
    %420 = math.exp %419 : vector<8x128xf32>
    %cst_116 = arith.constant 1.000000e+00 : f32
    %421 = vector.broadcast %cst_116 : f32 to vector<8x128xf32>
    %422 = arith.addf %421, %420 : vector<8x128xf32>
    %423 = arith.divf %421, %422 : vector<8x128xf32>
    %424 = vector.extract_strided_slice %423 {offsets = [0, 0], sizes = [8, 32], strides = [1, 1]} : vector<8x128xf32> to vector<8x32xf32>
    %425 = vector.extract_strided_slice %423 {offsets = [0, 32], sizes = [8, 32], strides = [1, 1]} : vector<8x128xf32> to vector<8x32xf32>
    %426 = vector.extract_strided_slice %423 {offsets = [0, 64], sizes = [8, 32], strides = [1, 1]} : vector<8x128xf32> to vector<8x32xf32>
    %cst_117 = arith.constant 2.000000e+00 : f32
    %427 = vector.broadcast %cst_117 : f32 to vector<8x32xf32>
    %428 = arith.mulf %427, %426 : vector<8x32xf32>
    %cst_118 = arith.constant 1.000000e+00 : f32
    %429 = vector.broadcast %cst_118 : f32 to vector<8x32xf32>
    %430 = arith.subf %428, %429 : vector<8x32xf32>
    %431 = vector.extract_strided_slice %423 {offsets = [0, 96], sizes = [8, 32], strides = [1, 1]} : vector<8x128xf32> to vector<8x32xf32>
    %432 = arith.mulf %425, %379 : vector<8x32xf32>
    %433 = arith.mulf %424, %430 : vector<8x32xf32>
    %434 = arith.addf %432, %433 : vector<8x32xf32>
    %435 = math.tanh %434 : vector<8x32xf32>
    %436 = arith.mulf %431, %435 : vector<8x32xf32>
    %cst_119 = arith.constant dense<0.000000e+00> : vector<8x128xf32>
    %437 = tpu.matmul %436, %1, %cst_119 {dimension_numbers = #tpu.dot_dimension_numbers<[1], [0], [0], [1], [0, 0, 1, 1], [], []>} : vector<8x32xf32>, vector<32x128xf32>, vector<8x128xf32> -> vector<8x128xf32>
    %438 = arith.addf %414, %437 : vector<8x128xf32>
    %439 = arith.negf %438 : vector<8x128xf32>
    %440 = math.exp %439 : vector<8x128xf32>
    %cst_120 = arith.constant 1.000000e+00 : f32
    %441 = vector.broadcast %cst_120 : f32 to vector<8x128xf32>
    %442 = arith.addf %441, %440 : vector<8x128xf32>
    %443 = arith.divf %441, %442 : vector<8x128xf32>
    %444 = vector.extract_strided_slice %443 {offsets = [0, 0], sizes = [8, 32], strides = [1, 1]} : vector<8x128xf32> to vector<8x32xf32>
    %445 = vector.extract_strided_slice %443 {offsets = [0, 32], sizes = [8, 32], strides = [1, 1]} : vector<8x128xf32> to vector<8x32xf32>
    %446 = vector.extract_strided_slice %443 {offsets = [0, 64], sizes = [8, 32], strides = [1, 1]} : vector<8x128xf32> to vector<8x32xf32>
    %cst_121 = arith.constant 2.000000e+00 : f32
    %447 = vector.broadcast %cst_121 : f32 to vector<8x32xf32>
    %448 = arith.mulf %447, %446 : vector<8x32xf32>
    %cst_122 = arith.constant 1.000000e+00 : f32
    %449 = vector.broadcast %cst_122 : f32 to vector<8x32xf32>
    %450 = arith.subf %448, %449 : vector<8x32xf32>
    %451 = vector.extract_strided_slice %443 {offsets = [0, 96], sizes = [8, 32], strides = [1, 1]} : vector<8x128xf32> to vector<8x32xf32>
    %452 = arith.mulf %445, %399 : vector<8x32xf32>
    %453 = arith.mulf %444, %450 : vector<8x32xf32>
    %454 = arith.addf %452, %453 : vector<8x32xf32>
    %455 = math.tanh %454 : vector<8x32xf32>
    %456 = arith.mulf %451, %455 : vector<8x32xf32>
    %457 = vector.broadcast %4 : vector<1x32xf32> to vector<8x32xf32>
    %458 = arith.mulf %456, %457 : vector<8x32xf32>
    %cst_123 = arith.constant dense<0.000000e+00> : vector<8xf32>
    %459 = vector.multi_reduction <add>, %458, %cst_123 [1] : vector<8x32xf32> to vector<8xf32>
    %460 = vector.shape_cast %459 : vector<8xf32> to vector<8x1xf32>
    %c7_i32 = arith.constant 7 : i32
    %461 = vector.broadcast %c7_i32 : i32 to vector<1x10xi32>
    %462 = arith.cmpi eq, %26, %461 : vector<1x10xi32>
    %463 = vector.shape_cast %462 : vector<1x10xi1> to vector<1x10xi1>
    %464 = vector.broadcast %463 : vector<1x10xi1> to vector<8x10xi1>
    %465 = vector.shape_cast %460 : vector<8x1xf32> to vector<8x1xf32>
    %466 = vector.broadcast %465 : vector<8x1xf32> to vector<8x10xf32>
    %467 = arith.select %464, %466, %412 : vector<8x10xi1>, vector<8x10xf32>
    %cst_124 = arith.constant dense<0.000000e+00> : vector<8x128xf32>
    %468 = tpu.matmul %456, %2, %cst_124 {dimension_numbers = #tpu.dot_dimension_numbers<[1], [0], [0], [1], [0, 0, 1, 1], [], []>} : vector<8x32xf32>, vector<32x128xf32>, vector<8x128xf32> -> vector<8x128xf32>
    %469 = arith.addf %468, %7 : vector<8x128xf32>
    %cst_125 = arith.constant dense<0.000000e+00> : vector<8x128xf32>
    %470 = tpu.matmul %436, %0, %cst_125 {dimension_numbers = #tpu.dot_dimension_numbers<[1], [0], [0], [1], [0, 0, 1, 1], [], []>} : vector<8x32xf32>, vector<32x128xf32>, vector<8x128xf32> -> vector<8x128xf32>
    %cst_126 = arith.constant dense<0.000000e+00> : vector<8x128xf32>
    %471 = tpu.matmul %456, %3, %cst_126 {dimension_numbers = #tpu.dot_dimension_numbers<[1], [0], [0], [1], [0, 0, 1, 1], [], []>} : vector<8x32xf32>, vector<32x128xf32>, vector<8x128xf32> -> vector<8x128xf32>
    %472 = arith.addf %470, %471 : vector<8x128xf32>
    %473 = arith.addf %472, %10 : vector<8x128xf32>
    %474 = arith.negf %473 : vector<8x128xf32>
    %475 = math.exp %474 : vector<8x128xf32>
    %cst_127 = arith.constant 1.000000e+00 : f32
    %476 = vector.broadcast %cst_127 : f32 to vector<8x128xf32>
    %477 = arith.addf %476, %475 : vector<8x128xf32>
    %478 = arith.divf %476, %477 : vector<8x128xf32>
    %479 = vector.extract_strided_slice %478 {offsets = [0, 0], sizes = [8, 32], strides = [1, 1]} : vector<8x128xf32> to vector<8x32xf32>
    %480 = vector.extract_strided_slice %478 {offsets = [0, 32], sizes = [8, 32], strides = [1, 1]} : vector<8x128xf32> to vector<8x32xf32>
    %481 = vector.extract_strided_slice %478 {offsets = [0, 64], sizes = [8, 32], strides = [1, 1]} : vector<8x128xf32> to vector<8x32xf32>
    %cst_128 = arith.constant 2.000000e+00 : f32
    %482 = vector.broadcast %cst_128 : f32 to vector<8x32xf32>
    %483 = arith.mulf %482, %481 : vector<8x32xf32>
    %cst_129 = arith.constant 1.000000e+00 : f32
    %484 = vector.broadcast %cst_129 : f32 to vector<8x32xf32>
    %485 = arith.subf %483, %484 : vector<8x32xf32>
    %486 = vector.extract_strided_slice %478 {offsets = [0, 96], sizes = [8, 32], strides = [1, 1]} : vector<8x128xf32> to vector<8x32xf32>
    %487 = arith.mulf %480, %434 : vector<8x32xf32>
    %488 = arith.mulf %479, %485 : vector<8x32xf32>
    %489 = arith.addf %487, %488 : vector<8x32xf32>
    %490 = math.tanh %489 : vector<8x32xf32>
    %491 = arith.mulf %486, %490 : vector<8x32xf32>
    %cst_130 = arith.constant dense<0.000000e+00> : vector<8x128xf32>
    %492 = tpu.matmul %491, %1, %cst_130 {dimension_numbers = #tpu.dot_dimension_numbers<[1], [0], [0], [1], [0, 0, 1, 1], [], []>} : vector<8x32xf32>, vector<32x128xf32>, vector<8x128xf32> -> vector<8x128xf32>
    %493 = arith.addf %469, %492 : vector<8x128xf32>
    %494 = arith.negf %493 : vector<8x128xf32>
    %495 = math.exp %494 : vector<8x128xf32>
    %cst_131 = arith.constant 1.000000e+00 : f32
    %496 = vector.broadcast %cst_131 : f32 to vector<8x128xf32>
    %497 = arith.addf %496, %495 : vector<8x128xf32>
    %498 = arith.divf %496, %497 : vector<8x128xf32>
    %499 = vector.extract_strided_slice %498 {offsets = [0, 0], sizes = [8, 32], strides = [1, 1]} : vector<8x128xf32> to vector<8x32xf32>
    %500 = vector.extract_strided_slice %498 {offsets = [0, 32], sizes = [8, 32], strides = [1, 1]} : vector<8x128xf32> to vector<8x32xf32>
    %501 = vector.extract_strided_slice %498 {offsets = [0, 64], sizes = [8, 32], strides = [1, 1]} : vector<8x128xf32> to vector<8x32xf32>
    %cst_132 = arith.constant 2.000000e+00 : f32
    %502 = vector.broadcast %cst_132 : f32 to vector<8x32xf32>
    %503 = arith.mulf %502, %501 : vector<8x32xf32>
    %cst_133 = arith.constant 1.000000e+00 : f32
    %504 = vector.broadcast %cst_133 : f32 to vector<8x32xf32>
    %505 = arith.subf %503, %504 : vector<8x32xf32>
    %506 = vector.extract_strided_slice %498 {offsets = [0, 96], sizes = [8, 32], strides = [1, 1]} : vector<8x128xf32> to vector<8x32xf32>
    %507 = arith.mulf %500, %454 : vector<8x32xf32>
    %508 = arith.mulf %499, %505 : vector<8x32xf32>
    %509 = arith.addf %507, %508 : vector<8x32xf32>
    %510 = math.tanh %509 : vector<8x32xf32>
    %511 = arith.mulf %506, %510 : vector<8x32xf32>
    %512 = vector.broadcast %4 : vector<1x32xf32> to vector<8x32xf32>
    %513 = arith.mulf %511, %512 : vector<8x32xf32>
    %cst_134 = arith.constant dense<0.000000e+00> : vector<8xf32>
    %514 = vector.multi_reduction <add>, %513, %cst_134 [1] : vector<8x32xf32> to vector<8xf32>
    %515 = vector.shape_cast %514 : vector<8xf32> to vector<8x1xf32>
    %c8_i32 = arith.constant 8 : i32
    %516 = vector.broadcast %c8_i32 : i32 to vector<1x10xi32>
    %517 = arith.cmpi eq, %26, %516 : vector<1x10xi32>
    %518 = vector.shape_cast %517 : vector<1x10xi1> to vector<1x10xi1>
    %519 = vector.broadcast %518 : vector<1x10xi1> to vector<8x10xi1>
    %520 = vector.shape_cast %515 : vector<8x1xf32> to vector<8x1xf32>
    %521 = vector.broadcast %520 : vector<8x1xf32> to vector<8x10xf32>
    %522 = arith.select %519, %521, %467 : vector<8x10xi1>, vector<8x10xf32>
    %cst_135 = arith.constant dense<0.000000e+00> : vector<8x128xf32>
    %523 = tpu.matmul %511, %2, %cst_135 {dimension_numbers = #tpu.dot_dimension_numbers<[1], [0], [0], [1], [0, 0, 1, 1], [], []>} : vector<8x32xf32>, vector<32x128xf32>, vector<8x128xf32> -> vector<8x128xf32>
    %524 = arith.addf %523, %7 : vector<8x128xf32>
    %cst_136 = arith.constant dense<0.000000e+00> : vector<8x128xf32>
    %525 = tpu.matmul %491, %0, %cst_136 {dimension_numbers = #tpu.dot_dimension_numbers<[1], [0], [0], [1], [0, 0, 1, 1], [], []>} : vector<8x32xf32>, vector<32x128xf32>, vector<8x128xf32> -> vector<8x128xf32>
    %cst_137 = arith.constant dense<0.000000e+00> : vector<8x128xf32>
    %526 = tpu.matmul %511, %3, %cst_137 {dimension_numbers = #tpu.dot_dimension_numbers<[1], [0], [0], [1], [0, 0, 1, 1], [], []>} : vector<8x32xf32>, vector<32x128xf32>, vector<8x128xf32> -> vector<8x128xf32>
    %527 = arith.addf %525, %526 : vector<8x128xf32>
    %528 = arith.addf %527, %10 : vector<8x128xf32>
    %529 = arith.negf %528 : vector<8x128xf32>
    %530 = math.exp %529 : vector<8x128xf32>
    %cst_138 = arith.constant 1.000000e+00 : f32
    %531 = vector.broadcast %cst_138 : f32 to vector<8x128xf32>
    %532 = arith.addf %531, %530 : vector<8x128xf32>
    %533 = arith.divf %531, %532 : vector<8x128xf32>
    %534 = vector.extract_strided_slice %533 {offsets = [0, 0], sizes = [8, 32], strides = [1, 1]} : vector<8x128xf32> to vector<8x32xf32>
    %535 = vector.extract_strided_slice %533 {offsets = [0, 32], sizes = [8, 32], strides = [1, 1]} : vector<8x128xf32> to vector<8x32xf32>
    %536 = vector.extract_strided_slice %533 {offsets = [0, 64], sizes = [8, 32], strides = [1, 1]} : vector<8x128xf32> to vector<8x32xf32>
    %cst_139 = arith.constant 2.000000e+00 : f32
    %537 = vector.broadcast %cst_139 : f32 to vector<8x32xf32>
    %538 = arith.mulf %537, %536 : vector<8x32xf32>
    %cst_140 = arith.constant 1.000000e+00 : f32
    %539 = vector.broadcast %cst_140 : f32 to vector<8x32xf32>
    %540 = arith.subf %538, %539 : vector<8x32xf32>
    %541 = vector.extract_strided_slice %533 {offsets = [0, 96], sizes = [8, 32], strides = [1, 1]} : vector<8x128xf32> to vector<8x32xf32>
    %542 = arith.mulf %535, %489 : vector<8x32xf32>
    %543 = arith.mulf %534, %540 : vector<8x32xf32>
    %544 = arith.addf %542, %543 : vector<8x32xf32>
    %545 = math.tanh %544 : vector<8x32xf32>
    %546 = arith.mulf %541, %545 : vector<8x32xf32>
    %cst_141 = arith.constant dense<0.000000e+00> : vector<8x128xf32>
    %547 = tpu.matmul %546, %1, %cst_141 {dimension_numbers = #tpu.dot_dimension_numbers<[1], [0], [0], [1], [0, 0, 1, 1], [], []>} : vector<8x32xf32>, vector<32x128xf32>, vector<8x128xf32> -> vector<8x128xf32>
    %548 = arith.addf %524, %547 : vector<8x128xf32>
    %549 = arith.negf %548 : vector<8x128xf32>
    %550 = math.exp %549 : vector<8x128xf32>
    %cst_142 = arith.constant 1.000000e+00 : f32
    %551 = vector.broadcast %cst_142 : f32 to vector<8x128xf32>
    %552 = arith.addf %551, %550 : vector<8x128xf32>
    %553 = arith.divf %551, %552 : vector<8x128xf32>
    %554 = vector.extract_strided_slice %553 {offsets = [0, 0], sizes = [8, 32], strides = [1, 1]} : vector<8x128xf32> to vector<8x32xf32>
    %555 = vector.extract_strided_slice %553 {offsets = [0, 32], sizes = [8, 32], strides = [1, 1]} : vector<8x128xf32> to vector<8x32xf32>
    %556 = vector.extract_strided_slice %553 {offsets = [0, 64], sizes = [8, 32], strides = [1, 1]} : vector<8x128xf32> to vector<8x32xf32>
    %cst_143 = arith.constant 2.000000e+00 : f32
    %557 = vector.broadcast %cst_143 : f32 to vector<8x32xf32>
    %558 = arith.mulf %557, %556 : vector<8x32xf32>
    %cst_144 = arith.constant 1.000000e+00 : f32
    %559 = vector.broadcast %cst_144 : f32 to vector<8x32xf32>
    %560 = arith.subf %558, %559 : vector<8x32xf32>
    %561 = vector.extract_strided_slice %553 {offsets = [0, 96], sizes = [8, 32], strides = [1, 1]} : vector<8x128xf32> to vector<8x32xf32>
    %562 = arith.mulf %555, %509 : vector<8x32xf32>
    %563 = arith.mulf %554, %560 : vector<8x32xf32>
    %564 = arith.addf %562, %563 : vector<8x32xf32>
    %565 = math.tanh %564 : vector<8x32xf32>
    %566 = arith.mulf %561, %565 : vector<8x32xf32>
    %567 = vector.broadcast %4 : vector<1x32xf32> to vector<8x32xf32>
    %568 = arith.mulf %566, %567 : vector<8x32xf32>
    %cst_145 = arith.constant dense<0.000000e+00> : vector<8xf32>
    %569 = vector.multi_reduction <add>, %568, %cst_145 [1] : vector<8x32xf32> to vector<8xf32>
    %570 = vector.shape_cast %569 : vector<8xf32> to vector<8x1xf32>
    %c9_i32 = arith.constant 9 : i32
    %571 = vector.broadcast %c9_i32 : i32 to vector<1x10xi32>
    %572 = arith.cmpi eq, %26, %571 : vector<1x10xi32>
    %573 = vector.shape_cast %572 : vector<1x10xi1> to vector<1x10xi1>
    %574 = vector.broadcast %573 : vector<1x10xi1> to vector<8x10xi1>
    %575 = vector.shape_cast %570 : vector<8x1xf32> to vector<8x1xf32>
    %576 = vector.broadcast %575 : vector<8x1xf32> to vector<8x10xf32>
    %577 = arith.select %574, %576, %522 : vector<8x10xi1>, vector<8x10xf32>
    %c0_146 = arith.constant 0 : index
    %c0_147 = arith.constant 0 : index
    %578 = vector.load %arg11[%c0_146, %c0_147] : memref<1x1xf32, #tpu.memory_space<vmem>>, vector<1x1xf32>
    %579 = vector.broadcast %578 : vector<1x1xf32> to vector<8x10xf32>
    %580 = arith.addf %577, %579 : vector<8x10xf32>
    %c0_148 = arith.constant 0 : index
    %c0_149 = arith.constant 0 : index
    %581 = vector.load %arg12[%c0_148, %c0_149] : memref<8x10xf32, #tpu.memory_space<vmem>>, vector<8x10xf32>
    tpu.vector_store %arg12[%c0_148, %c0_149], %580 {strides = array<i32>} : memref<8x10xf32, #tpu.memory_space<vmem>>, vector<8x10xf32>,
    return
  }
  func.func @transform_0(%arg0: i32) -> (i32, i32, i32) {
    %c0_i32 = arith.constant 0 : i32
    %c0_i32_0 = arith.constant 0 : i32
    %c0_i32_1 = arith.constant 0 : i32
    return %c0_i32, %arg0, %c0_i32_0 : i32, i32, i32
  }
  func.func @transform_1(%arg0: i32) -> (i32, i32) {
    %c0_i32 = arith.constant 0 : i32
    %c0_i32_0 = arith.constant 0 : i32
    %c0_i32_1 = arith.constant 0 : i32
    return %c0_i32, %c0_i32_0 : i32, i32
  }
  func.func @transform_2(%arg0: i32) -> (i32, i32) {
    %c0_i32 = arith.constant 0 : i32
    %c0_i32_0 = arith.constant 0 : i32
    %c0_i32_1 = arith.constant 0 : i32
    return %c0_i32, %c0_i32_0 : i32, i32
  }
  func.func @transform_3(%arg0: i32) -> (i32, i32) {
    %c0_i32 = arith.constant 0 : i32
    %c0_i32_0 = arith.constant 0 : i32
    %c0_i32_1 = arith.constant 0 : i32
    return %c0_i32, %c0_i32_0 : i32, i32
  }
  func.func @transform_4(%arg0: i32) -> (i32, i32) {
    %c0_i32 = arith.constant 0 : i32
    %c0_i32_0 = arith.constant 0 : i32
    %c0_i32_1 = arith.constant 0 : i32
    return %c0_i32, %c0_i32_0 : i32, i32
  }
  func.func @transform_5(%arg0: i32) -> (i32, i32) {
    %c0_i32 = arith.constant 0 : i32
    %c0_i32_0 = arith.constant 0 : i32
    %c0_i32_1 = arith.constant 0 : i32
    return %c0_i32, %c0_i32_0 : i32, i32
  }
  func.func @transform_6(%arg0: i32) -> (i32, i32) {
    %c0_i32 = arith.constant 0 : i32
    %c0_i32_0 = arith.constant 0 : i32
    %c0_i32_1 = arith.constant 0 : i32
    return %c0_i32, %c0_i32_0 : i32, i32
  }
  func.func @transform_7(%arg0: i32) -> (i32, i32) {
    %c0_i32 = arith.constant 0 : i32
    %c0_i32_0 = arith.constant 0 : i32
    %c0_i32_1 = arith.constant 0 : i32
    return %c0_i32, %c0_i32_0 : i32, i32
  }
  func.func @transform_8(%arg0: i32) -> (i32, i32) {
    %c0_i32 = arith.constant 0 : i32
    %c0_i32_0 = arith.constant 0 : i32
    %c0_i32_1 = arith.constant 0 : i32
    return %c0_i32, %c0_i32_0 : i32, i32
  }
  func.func @transform_9(%arg0: i32) -> (i32, i32) {
    %c0_i32 = arith.constant 0 : i32
    %c0_i32_0 = arith.constant 0 : i32
    %c0_i32_1 = arith.constant 0 : i32
    return %c0_i32, %c0_i32_0 : i32, i32
  }
  func.func @transform_10(%arg0: i32) -> (i32, i32) {
    %c0_i32 = arith.constant 0 : i32
    %c0_i32_0 = arith.constant 0 : i32
    %c0_i32_1 = arith.constant 0 : i32
    return %c0_i32, %c0_i32_0 : i32, i32
  }
  func.func @transform_11(%arg0: i32) -> (i32, i32) {
    %c0_i32 = arith.constant 0 : i32
    %c0_i32_0 = arith.constant 0 : i32
    return %arg0, %c0_i32 : i32, i32
  }
}

</mosaic_0001>

<bundles_post_ra>
// kernel: tpu_custom_call.1
= control target key start
LH: loop header
LB: loop body
LE: loop exit
PB: predicated region body
PF: predicated region fallthrough
CT: control target
= control target key end

     0   :  { %s2776_s0 = inlined_call_operand.vmem [shape: f32[8,8,1], index: 0, kind: input, shape index: {}]   ;;  %s2777_s1 = inlined_call_operand.vmem [shape: f32[1,128], index: 1, kind: input, shape index: {}]   ;;  %s2778_s2 = inlined_call_operand.vmem [shape: f32[32,128], index: 2, kind: input, shape index: {}]   ;;  %s2779_s3 = inlined_call_operand.vmem [shape: f32[1,128], index: 3, kind: input, shape index: {}]   ;;  %s2780_s4 = inlined_call_operand.vmem [shape: f32[32,128], index: 4, kind: input, shape index: {}]   ;;  %s2781_s5 = inlined_call_operand.hbm [shape: f32[32,128], index: 5, kind: input, shape index: {}]   ;;  %s2782_s6 = inlined_call_operand.vmem [shape: f32[1,128], index: 6, kind: input, shape index: {}]   ;;  %s2783_s7 = inlined_call_operand.hbm [shape: f32[32,128], index: 7, kind: input, shape index: {}]   ;;  %s2784_s8 = inlined_call_operand.vmem [shape: f32[1,128], index: 8, kind: input, shape index: {}]   ;;  %s2785_s9 = inlined_call_operand.vmem [shape: f32[1,32], index: 9, kind: input, shape index: {}]   ;;  %s2786_s10 = inlined_call_operand.<no memory space> [shape: f32[1,1], index: 10, kind: input, shape index: {}]   ;;  %s2787_s11 = inlined_call_operand.hbm [shape: f32[8,10], index: 11, kind: output, shape index: {}]  }
   0x1   :  { %v16_v0 = vstv %s2786_s10 }
   0x2   :  { %17 = vst [vmem:[#allocation3] sm:$0x1] %v16_v0 }
   0x3   :  { %18 = vsyncpa [#allocation5], 0 }
   0x4   :  { %19 = vsyncpa [#allocation8], 0 }
   0x5   :  { %20 = vsyncpa [#allocation6], 0  ;;  %s35_s21 = sshll.u32 %s2781_s5, 4  ;;  %s2169_s22 = smov [#allocation4]   ;;  %s36_s21 = int_to_ptr.hbm [resolvable:$true] %s35_s21 }
   0x6   :  { %s37_s23 = sshll.u32 %s2169_s22, 4  ;;  %s50_s26 = sshll.u32 %s2783_s7, 4  ;;  %s38_s23 = int_to_ptr.vmem [resolvable:$true] %s37_s23  ;;  %s51_s26 = int_to_ptr.hbm [resolvable:$true] %s50_s26 }
   0x7   :  { %s2170_s27 = smov 128   ;;  %s2171_s28 = smov 8  }
   0x8   :  { %43 = dma.hbm_to_vmem [thread:$0]  %s36_s21, 512, %s38_s23, [#allocation5], %s2170_s27, %s2170_s27, %s2171_s28  }
   0x9   :  { %s2172_s10 = smov [#allocation7]  }
   0xa   :  { %s52_s29 = sshll.u32 %s2172_s10, 4  ;;  %s53_s29 = int_to_ptr.vmem [resolvable:$true] %s52_s29 }
   0xb   :  { %58 = dma.hbm_to_vmem [thread:$0]  %s51_s26, 512, %s53_s29, [#allocation8], %s2170_s27, %s2170_s27, %s2171_s28  }
   0xc   :  { %2163 = dma.done.wait [#allocation5], 512  }
   0xd   :  { %2164 = vsyncadd [#allocation5], 4294966784 }
   0xe   :  { %2165 = dma.done.wait [#allocation8], 512  }
   0xf   :  { %2166 = vsyncadd [#allocation8], 4294966784  ;;  %v2173_v1 = vmov 0   ;;  %v2251_v2 = vld [vmem:[%s2778_s2 + $0x18] sm:$0xff]  ;;  %v2256_v3 = vld [vmem:[%s2778_s2 + $0x10] sm:$0xff]  ;;  %v2174_v7 = vmov 0.0  }
  0x10   :  { %1947 = vset.pattern.permute.xlu0 %v2173_v1  ;;  %1948 = vset.pattern.permute.xlu2 %v2173_v1  ;;  %v98_v4 = vld [vmem:[%s2776_s0] sm:$0xff]  ;;  %v2265_v5 = vld [vmem:[%s2778_s2 + $0x8] sm:$0xff]  ;;  %s2175_s23 = smov 64   ;;  %s2176_s24 = smov 32   ;;  %v2296_v37 = vld [vmem:[#allocation4 + $0x10] sm:$0xff]  ;;  %vm180_vm4 = vcmask 261120  }
  0x11   :  { %1949 = vset.pattern.permute.xlu1 %v2173_v1  ;;  %217 = vmatpush.msra.mxu1 %v2251_v2  ;;  %v2271_v6 = vld [vmem:[%s2778_s2] sm:$0xff]  ;;  %v2302_v38 = vld [vmem:[%s2780_s4 + $0x18] sm:$0xff]  ;;  %v2307_v39 = vld [vmem:[%s2780_s4 + $0x10] sm:$0xff]  ;;  %s2177_s28 = smov 96   ;;  %s1856_s29 = sshll.u32 %s2787_s11, 4  ;;  %s1857_s29 = int_to_ptr.hbm [resolvable:$true] %s1856_s29 }
  0x12   :  { %109 = vperm.xlu0 %1947, %v98_v4   ;;  %v2279_v8 = vld [vmem:[%s2777_s1] ss:$0 sm:$0xff]  ;;  %v2310_v40 = vld [vmem:[#allocation4 + $0x8] sm:$0xff]  ;;  %281 = vmatpush.msra.mxu2 %v2302_v38  ;;  %v2321_v42 = vld [vmem:[#allocation4] sm:$0xff] }
  0x13   :  { %218 = vmatpush.msra.mxu1 %v2256_v3  ;;  %v2285_v11 = vld [vmem:[%s2779_s3] ss:$0 sm:$0xff]  ;;  %v2318_v41 = vld [vmem:[%s2780_s4 + $0x8] sm:$0xff] }
  0x14   :  { %v2294_v36 = vld [vmem:[#allocation4 + $0x18] sm:$0xff]  ;;  %282 = vmatpush.msra.mxu2 %v2307_v39  ;;  %v99_v46 = vld [vmem:[%s2776_s0 + $0x8] sm:$0xff] }
  0x15   :  { %219 = vmatpush.msra.mxu1 %v2265_v5  ;;  %196 = vmatpush.msra.mxu0 %v2294_v36  ;;  %v2329_v43 = vld [vmem:[%s2780_s4] sm:$0xff] }
  0x16   :  { %362 = vmatpush.msra.mxu3 %v2294_v36  ;;  %283 = vmatpush.msra.mxu2 %v2318_v41  ;;  %v2378_v52 = vld [vmem:[%s2782_s6] ss:$0 sm:$0xff] }
  0x17   :  { %220 = vmatpush.msra.mxu1 %v2271_v6  ;;  %197 = vmatpush.msra.mxu0 %v2296_v37 }
  0x18   :  { %221 = vmatmul.f32.vlgmr.msra.gmra.mxu1 %v2174_v7  ;;  %363 = vmatpush.msra.mxu3 %v2296_v37 }
  0x19   :  { %448 = vmatpush.msrb.mxu1 %v2302_v38  ;;  %198 = vmatpush.msra.mxu0 %v2310_v40 }
  0x1a   :  { %364 = vmatpush.msra.mxu3 %v2310_v40  ;;  %284 = vmatpush.msra.mxu2 %v2329_v43 }
  0x1b   :  { %449 = vmatpush.msrb.mxu1 %v2307_v39  ;;  %199 = vmatpush.msra.mxu0 %v2321_v42 }
  0x1c   :  { %365 = vmatpush.msra.mxu3 %v2321_v42  ;;  %200 = vmatmul.f32.vlgmr.msra.gmra.mxu0 %v2174_v7 }
  0x1d   :  { %450 = vmatpush.msrb.mxu1 %v2318_v41  ;;  %384 = vmatpush.msrb.mxu0 %v2251_v2 }
  0x1e   :  { %546 = vmatpush.msrb.mxu3 %v2251_v2  ;;  %524 = vmatpush.msrb.mxu2 %v2294_v36 }
  0x1f   :  { %451 = vmatpush.msrb.mxu1 %v2329_v43  ;;  %385 = vmatpush.msrb.mxu0 %v2256_v3 }
  0x20   :  { %547 = vmatpush.msrb.mxu3 %v2256_v3  ;;  %525 = vmatpush.msrb.mxu2 %v2296_v37 }
  0x21   :  { %686 = vmatpush.msra.mxu1 %v2294_v36  ;;  %386 = vmatpush.msrb.mxu0 %v2265_v5 }
  0x22   :  { %548 = vmatpush.msrb.mxu3 %v2265_v5  ;;  %526 = vmatpush.msrb.mxu2 %v2310_v40 }
  0x23   :  { %687 = vmatpush.msra.mxu1 %v2296_v37  ;;  %387 = vmatpush.msrb.mxu0 %v2271_v6 }
  0x24   :  { %549 = vmatpush.msrb.mxu3 %v2271_v6  ;;  %527 = vmatpush.msrb.mxu2 %v2321_v42 }
  0x25   :  { %688 = vmatpush.msra.mxu1 %v2310_v40  ;;  %610 = vmatpush.msra.mxu0 %v2302_v38 }
  0x27   :  { %689 = vmatpush.msra.mxu1 %v2321_v42  ;;  %611 = vmatpush.msra.mxu0 %v2307_v39 }
  0x29   :  { %612 = vmatpush.msra.mxu0 %v2318_v41 }
  0x2b   :  { %613 = vmatpush.msra.mxu0 %v2329_v43 }
  0x84   :  { %v110_v9 = vpop.permute.xlu0 %109 }
  0x85   :  { %v150_v10 = vmul.f32 %v2279_v8, %v110_v9 }
  0x87   :  { %v162_v12 = vadd.f32 %v2285_v11, %v150_v10 }
  0x95   :  { %v222_v13 = vpop.f32.mrf.mxu1 }
  0x96   :  { %v225_v14 = vadd.f32 %v222_v13, %v162_v12 }
  0x98   :  { %v1867_v15 = vmul.f32 -1.442695, %v225_v14 }
  0x99   :  { %v201_v48 = vpop.f32.mrf.mxu0 }
  0x9a   :  { %1956 = vpow2.f32 %v1867_v15  ;;  %v202_v55 = vadd.f32 %v2378_v52, %v201_v48 }
  0xa0   :  { %v1957_v16 = vpop.eup %1956 }
  0xa1   :  { %v229_v17 = vadd.f32 1.0, %v1957_v16 }
  0xa3   :  { %1958 = vrcp.f32 %v229_v17  ;;  %v241_v21 = vand.u32 2147483648, %v229_v17  ;;  %v239_v23 = vand.u32 2147483647, %v229_v17  ;;  %vm235_vm1 = vweird.f32 %v229_v17 }
  0xa5   :  { %v242_v25 = vor.u32 1.1754944e-38, %v241_v21  ;;  %vm240_vm3 = vcmp.eq.f32.partialorder %v239_v23, 8.507059e+37 }
  0xa9   :  { %v1959_v18 = vpop.eup %1958 }
  0xaa   :  { %v231_v19 = vmul.f32 %v1959_v18, %v229_v17  ;;  %vm236_vm0 = vweird.f32 %v1959_v18 }
  0xab   :  { %vm237_vm2 = vmor %vm235_vm1, %vm236_vm0 }
  0xac   :  { %v232_v20 = vsub.f32 1.0, %v231_v19 }
  0xae   :  { %v233_v22 = vmul.f32 %v1959_v18, %v232_v20 }
  0xb0   :  { %v234_v24 = vadd.f32 %v1959_v18, %v233_v22 }
  0xb2   :  { %v238_v26 = vsel %vm237_vm2, %v1959_v18, %v234_v24 }
  0xb3   :  { %v243_v27 = vsel %vm240_vm3, %v242_v25, %v238_v26 }
  0xb4   :  { %v245_v28 = vmul.f32 2.0, %v243_v27  ;;  %v247_v32 = vmul.f32 0.0, %v243_v27 }
  0xb6   :  { %v1868_v29 = vadd.f32 -1.0, %v245_v28 }
  0xb8   :  { %249 = vrot.lane.b32.xlu0 %v1868_v29, %s2175_s23 }
 0x12a   :  { %v250_v30 = vpop.permute.xlu0 %249 }
 0x12b   :  { %v252_v31 = vmul.f32 %v250_v30, %v243_v27 }
 0x12d   :  { %254 = vrot.lane.b32.xlu1 %v252_v31, %s2176_s24 }
 0x19f   :  { %v255_v33 = vpop.permute.xlu1 %254 }
 0x1a0   :  { %v2290_v34 = vadd.f32 %v255_v33, %v247_v32 }
 0x1a2   :  { %1960 = vtanh.f32 %v2290_v34 }
 0x1a8   :  { %v1961_v35 = vpop.eup %1960 }
 0x1a9   :  { %260 = vrot.lane.b32.xlu1 %v1961_v35, %s2175_s23 }
 0x21b   :  { %v261_v44 = vpop.permute.xlu1 %260 }
 0x21c   :  { %v263_v45 = vmul.f32 %v261_v44, %v243_v27 }
 0x21e   :  { %265 = vrot.lane.b32.xlu2 %v263_v45, %s2176_s24 }
 0x226   :  { %114 = vperm.xlu2 %1948, %v99_v46  }
 0x278   :  { %v266_v47 = vpop.permute.xlu2 %265 }
 0x279   :  { %1869 = vmatmul.msk.f32.vlgmr.msra.gmra.mxu2 %vm180_vm4, %v266_v47  ;;  %1873 = vmatmul.msk.f32.vlgmr.msrb.gmra.mxu0 %vm180_vm4, %v266_v47 }
 0x27a   :  { %708 = vmatpush.msra.mxu2 %v2251_v2  ;;  %848 = vmatpush.msrb.mxu0 %v2294_v36 }
 0x27c   :  { %709 = vmatpush.msra.mxu2 %v2256_v3  ;;  %849 = vmatpush.msrb.mxu0 %v2296_v37 }
 0x27e   :  { %710 = vmatpush.msra.mxu2 %v2265_v5  ;;  %850 = vmatpush.msrb.mxu0 %v2310_v40 }
 0x280   :  { %711 = vmatpush.msra.mxu2 %v2271_v6  ;;  %851 = vmatpush.msrb.mxu0 %v2321_v42  ;;  %v115_v49 = vpop.permute.xlu2 %114 }
 0x281   :  { %v151_v50 = vmul.f32 %v2279_v8, %v115_v49 }
 0x283   :  { %v163_v51 = vadd.f32 %v2285_v11, %v151_v50 }
 0x2f6   :  { %v389_v53 = vpop.f32.mrf.mxu0 }
 0x2f7   :  { %v392_v54 = vadd.f32 %v389_v53, %v163_v51  ;;  %v100_v51 = vld [vmem:[%s2776_s0 + $0x10] sm:$0xff] }
 0x2f9   :  { %v1874_v56 = vmul.f32 -1.442695, %v392_v54 }
 0x2fb   :  { %1962 = vpow2.f32 %v1874_v56 }
 0x2fc   :  { %v286_v57 = vpop.f32.mrf.mxu2 }
 0x2fd   :  { %v289_v58 = vadd.f32 %v286_v57, %v202_v55 }
 0x2ff   :  { %v1870_v59 = vmul.f32 -1.442695, %v289_v58 }
 0x301   :  { %v1963_v60 = vpop.eup %1962  ;;  %1964 = vpow2.f32 %v1870_v59 }
 0x302   :  { %v396_v61 = vadd.f32 1.0, %v1963_v60 }
 0x304   :  { %1966 = vrcp.f32 %v396_v61  ;;  %v408_v7 = vand.u32 2147483648, %v396_v61  ;;  %v406_v10 = vand.u32 2147483647, %v396_v61  ;;  %vm402_vm6 = vweird.f32 %v396_v61 }
 0x306   :  { %v409_v15 = vor.u32 1.1754944e-38, %v408_v7  ;;  %vm407_vm8 = vcmp.eq.f32.partialorder %v406_v10, 8.507059e+37 }
 0x307   :  { %v1965_v62 = vpop.eup %1964 }
 0x308   :  { %v293_v63 = vadd.f32 1.0, %v1965_v62 }
 0x30a   :  { %v1967_v0 = vpop.eup %1966  ;;  %1968 = vrcp.f32 %v293_v63  ;;  %v305_v19 = vand.u32 2147483648, %v293_v63  ;;  %v303_v22 = vand.u32 2147483647, %v293_v63  ;;  %vm299_vm10 = vweird.f32 %v293_v63 }
 0x30b   :  { %v398_v1 = vmul.f32 %v1967_v0, %v396_v61  ;;  %vm403_vm5 = vweird.f32 %v1967_v0 }
 0x30c   :  { %vm404_vm7 = vmor %vm402_vm6, %vm403_vm5  ;;  %v306_v25 = vor.u32 1.1754944e-38, %v305_v19  ;;  %vm304_vm12 = vcmp.eq.f32.partialorder %v303_v22, 8.507059e+37 }
 0x30d   :  { %v399_v4 = vsub.f32 1.0, %v398_v1 }
 0x30f   :  { %v400_v9 = vmul.f32 %v1967_v0, %v399_v4 }
 0x310   :  { %v1969_v12 = vpop.eup %1968 }
 0x311   :  { %v295_v13 = vmul.f32 %v1969_v12, %v293_v63  ;;  %v401_v14 = vadd.f32 %v1967_v0, %v400_v9  ;;  %vm300_vm9 = vweird.f32 %v1969_v12 }
 0x312   :  { %vm301_vm11 = vmor %vm299_vm10, %vm300_vm9 }
 0x313   :  { %v296_v16 = vsub.f32 1.0, %v295_v13  ;;  %v405_v17 = vsel %vm404_vm7, %v1967_v0, %v401_v14 }
 0x314   :  { %v410_v18 = vsel %vm407_vm8, %v409_v15, %v405_v17 }
 0x315   :  { %v412_v20 = vmul.f32 2.0, %v410_v18  ;;  %v297_v21 = vmul.f32 %v1969_v12, %v296_v16  ;;  %v414_v47 = vmul.f32 %v410_v18, %v2290_v34 }
 0x317   :  { %v1875_v23 = vadd.f32 -1.0, %v412_v20  ;;  %v298_v24 = vadd.f32 %v1969_v12, %v297_v21 }
 0x319   :  { %416 = vrot.lane.b32.xlu1 %v1875_v23, %s2175_s23  ;;  %v302_v26 = vsel %vm301_vm11, %v1969_v12, %v298_v24 }
 0x31a   :  { %v307_v27 = vsel %vm304_vm12, %v306_v25, %v302_v26 }
 0x31b   :  { %v309_v28 = vmul.f32 2.0, %v307_v27  ;;  %v311_v35 = vmul.f32 0.0, %v307_v27 }
 0x31d   :  { %v1871_v29 = vadd.f32 -1.0, %v309_v28 }
 0x31f   :  { %313 = vrot.lane.b32.xlu0 %v1871_v29, %s2175_s23 }
 0x38b   :  { %v417_v30 = vpop.permute.xlu1 %416 }
 0x38c   :  { %v419_v31 = vmul.f32 %v417_v30, %v410_v18 }
 0x38e   :  { %421 = vrot.lane.b32.xlu0 %v419_v31, %s2176_s24 }
 0x391   :  { %v314_v32 = vpop.permute.xlu0 %313 }
 0x392   :  { %v316_v33 = vmul.f32 %v314_v32, %v307_v27 }
 0x394   :  { %318 = vrot.lane.b32.xlu2 %v316_v33, %s2176_s24 }
 0x3ee   :  { %v319_v44 = vpop.permute.xlu2 %318 }
 0x3ef   :  { %v2385_v45 = vadd.f32 %v319_v44, %v311_v35 }
 0x3f1   :  { %1970 = vtanh.f32 %v2385_v45 }
 0x3f7   :  { %v1971_v46 = vpop.eup %1970 }
 0x3f8   :  { %324 = vrot.lane.b32.xlu1 %v1971_v46, %s2175_s23 }
 0x400   :  { %v422_v48 = vpop.permute.xlu0 %421 }
 0x401   :  { %v2390_v49 = vadd.f32 %v422_v48, %v414_v47 }
 0x403   :  { %1972 = vtanh.f32 %v2390_v49 }
 0x409   :  { %v1973_v50 = vpop.eup %1972 }
 0x40a   :  { %427 = vrot.lane.b32.xlu2 %v1973_v50, %s2175_s23 }
 0x412   :  { %119 = vperm.xlu2 %1948, %v100_v51  }
 0x464   :  { %v428_v53 = vpop.permute.xlu2 %427 }
 0x465   :  { %v430_v54 = vmul.f32 %v428_v53, %v410_v18 }
 0x467   :  { %432 = vrot.lane.b32.xlu1 %v430_v54, %s2176_s24 }
 0x46a   :  { %v325_v55 = vpop.permute.xlu1 %324 }
 0x46b   :  { %v2398_v56 = vmul.f32 %v325_v55, %v307_v27 }
 0x46c   :  { %v120_v58 = vpop.permute.xlu2 %119 }
 0x46d   :  { %346 = vrot.lane.b32.xlu0 %v2398_v56, %s2176_s24  ;;  %v152_v62 = vmul.f32 %v2279_v8, %v120_v58 }
 0x46f   :  { %v164_v1 = vadd.f32 %v2285_v11, %v152_v62 }
 0x4d9   :  { %v433_v34 = vpop.permute.xlu1 %432 }
 0x4da   :  { %1876 = vmatmul.msk.f32.vlgmr.msrb.gmra.mxu1 %vm180_vm4, %v433_v34 }
 0x4db   :  { %870 = vmatpush.msrb.mxu1 %v2251_v2 }
 0x4dd   :  { %871 = vmatpush.msrb.mxu1 %v2256_v3 }
 0x4df   :  { %v347_v57 = vpop.permute.xlu0 %346  ;;  %872 = vmatpush.msrb.mxu1 %v2265_v5 }
 0x4e0   :  { %1872 = vmatmul.msk.f32.vlgmr.msra.gmra.mxu3 %vm180_vm4, %v347_v57 }
 0x4e1   :  { %772 = vmatpush.msra.mxu3 %v2302_v38  ;;  %873 = vmatpush.msrb.mxu1 %v2271_v6 }
 0x4e3   :  { %773 = vmatpush.msra.mxu3 %v2307_v39 }
 0x4e5   :  { %774 = vmatpush.msra.mxu3 %v2318_v41 }
 0x4e7   :  { %775 = vmatpush.msra.mxu3 %v2329_v43 }
 0x4e8   :  { %1880 = vmatmul.msk.f32.vlgmr.msrb.gmra.mxu3 %vm180_vm4, %v433_v34 }
 0x4e9   :  { %1010 = vmatpush.msrb.mxu3 %v2294_v36 }
 0x4eb   :  { %1011 = vmatpush.msrb.mxu3 %v2296_v37 }
 0x4ed   :  { %1012 = vmatpush.msrb.mxu3 %v2310_v40 }
 0x4ef   :  { %1013 = vmatpush.msrb.mxu3 %v2321_v42 }
 0x557   :  { %v453_v61 = vpop.f32.mrf.mxu1 }
 0x563   :  { %v367_v59 = vpop.f32.mrf.mxu3 }
 0x564   :  { %v368_v60 = vadd.f32 %v2378_v52, %v367_v59 }
 0x566   :  { %v456_v63 = vadd.f32 %v453_v61, %v368_v60 }
 0x568   :  { %v1877_v0 = vmul.f32 -1.442695, %v456_v63 }
 0x56a   :  { %1974 = vpow2.f32 %v1877_v0 }
 0x56b   :  { %v551_v4 = vpop.f32.mrf.mxu3 }
 0x56c   :  { %v554_v7 = vadd.f32 %v551_v4, %v164_v1 }
 0x56e   :  { %v1881_v9 = vmul.f32 -1.442695, %v554_v7 }
 0x570   :  { %v1975_v10 = vpop.eup %1974  ;;  %1976 = vpow2.f32 %v1881_v9 }
 0x571   :  { %v460_v12 = vadd.f32 1.0, %v1975_v10 }
 0x573   :  { %1978 = vrcp.f32 %v460_v12  ;;  %v472_v18 = vand.u32 2147483648, %v460_v12  ;;  %v470_v20 = vand.u32 2147483647, %v460_v12  ;;  %vm466_vm14 = vweird.f32 %v460_v12 }
 0x575   :  { %v473_v24 = vor.u32 1.1754944e-38, %v472_v18  ;;  %vm471_vm0 = vcmp.eq.f32.partialorder %v470_v20, 8.507059e+37 }
 0x576   :  { %v1977_v13 = vpop.eup %1976 }
 0x577   :  { %v558_v14 = vadd.f32 1.0, %v1977_v13 }
 0x579   :  { %v1979_v15 = vpop.eup %1978  ;;  %1980 = vrcp.f32 %v558_v14  ;;  %v570_v28 = vand.u32 2147483648, %v558_v14  ;;  %v568_v31 = vand.u32 2147483647, %v558_v14  ;;  %vm564_vm2 = vweird.f32 %v558_v14 }
 0x57a   :  { %v462_v16 = vmul.f32 %v1979_v15, %v460_v12  ;;  %vm467_vm13 = vweird.f32 %v1979_v15 }
 0x57b   :  { %vm468_vm15 = vmor %vm466_vm14, %vm467_vm13  ;;  %v571_v35 = vor.u32 1.1754944e-38, %v570_v28  ;;  %vm569_vm5 = vcmp.eq.f32.partialorder %v568_v31, 8.507059e+37 }
 0x57c   :  { %v463_v17 = vsub.f32 1.0, %v462_v16 }
 0x57e   :  { %v464_v19 = vmul.f32 %v1979_v15, %v463_v17 }
 0x57f   :  { %v1981_v21 = vpop.eup %1980 }
 0x580   :  { %v560_v22 = vmul.f32 %v1981_v21, %v558_v14  ;;  %v465_v23 = vadd.f32 %v1979_v15, %v464_v19  ;;  %vm565_vm1 = vweird.f32 %v1981_v21 }
 0x581   :  { %vm566_vm3 = vmor %vm564_vm2, %vm565_vm1 }
 0x582   :  { %v561_v25 = vsub.f32 1.0, %v560_v22  ;;  %v469_v26 = vsel %vm468_vm15, %v1979_v15, %v465_v23 }
 0x583   :  { %v474_v27 = vsel %vm471_vm0, %v473_v24, %v469_v26 }
 0x584   :  { %v476_v29 = vmul.f32 2.0, %v474_v27  ;;  %v562_v30 = vmul.f32 %v1981_v21, %v561_v25  ;;  %v478_v55 = vmul.f32 %v474_v27, %v2385_v45  ;;  %v101_v45 = vld [vmem:[%s2776_s0 + $0x18] sm:$0xff] }
 0x586   :  { %v1878_v32 = vadd.f32 -1.0, %v476_v29  ;;  %v563_v33 = vadd.f32 %v1981_v21, %v562_v30 }
 0x588   :  { %480 = vrot.lane.b32.xlu0 %v1878_v32, %s2175_s23  ;;  %v567_v44 = vsel %vm566_vm3, %v1981_v21, %v563_v33 }
 0x589   :  { %v572_v46 = vsel %vm569_vm5, %v571_v35, %v567_v44 }
 0x58a   :  { %v574_v47 = vmul.f32 2.0, %v572_v46  ;;  %v576_v59 = vmul.f32 %v572_v46, %v2390_v49 }
 0x58c   :  { %v1882_v48 = vadd.f32 -1.0, %v574_v47 }
 0x58e   :  { %578 = vrot.lane.b32.xlu1 %v1882_v48, %s2175_s23 }
 0x5fa   :  { %v481_v50 = vpop.permute.xlu0 %480 }
 0x5fb   :  { %v483_v51 = vmul.f32 %v481_v50, %v474_v27 }
 0x5fd   :  { %485 = vrot.lane.b32.xlu2 %v483_v51, %s2176_s24 }
 0x600   :  { %v579_v53 = vpop.permute.xlu1 %578 }
 0x601   :  { %v581_v54 = vmul.f32 %v579_v53, %v572_v46 }
 0x603   :  { %583 = vrot.lane.b32.xlu0 %v581_v54, %s2176_s24 }
 0x657   :  { %v486_v34 = vpop.permute.xlu2 %485 }
 0x658   :  { %v2425_v57 = vadd.f32 %v486_v34, %v478_v55 }
 0x65a   :  { %1982 = vtanh.f32 %v2425_v57 }
 0x660   :  { %v1983_v58 = vpop.eup %1982 }
 0x661   :  { %491 = vrot.lane.b32.xlu1 %v1983_v58, %s2175_s23 }
 0x675   :  { %v584_v60 = vpop.permute.xlu0 %583 }
 0x676   :  { %v2430_v61 = vadd.f32 %v584_v60, %v576_v59 }
 0x678   :  { %1984 = vtanh.f32 %v2430_v61 }
 0x67e   :  { %v1985_v62 = vpop.eup %1984 }
 0x67f   :  { %589 = vrot.lane.b32.xlu2 %v1985_v62, %s2175_s23 }
 0x687   :  { %124 = vperm.xlu2 %1948, %v101_v45  }
 0x6d3   :  { %v492_v63 = vpop.permute.xlu1 %491 }
 0x6d4   :  { %v2437_v0 = vmul.f32 %v492_v63, %v474_v27 }
 0x6d6   :  { %508 = vrot.lane.b32.xlu0 %v2437_v0, %s2176_s24 }
 0x6d9   :  { %v590_v49 = vpop.permute.xlu2 %589 }
 0x6da   :  { %v592_v1 = vmul.f32 %v590_v49, %v572_v46 }
 0x6dc   :  { %594 = vrot.lane.b32.xlu1 %v592_v1, %s2176_s24 }
 0x6e1   :  { %v125_v9 = vpop.permute.xlu2 %124 }
 0x6e2   :  { %v153_v14 = vmul.f32 %v2279_v8, %v125_v9 }
 0x6e4   :  { %v165_v17 = vadd.f32 %v2285_v11, %v153_v14 }
 0x748   :  { %v509_v4 = vpop.permute.xlu0 %508 }
 0x749   :  { %1879 = vmatmul.msk.f32.vlgmr.msrb.gmra.mxu2 %vm180_vm4, %v509_v4 }
 0x74a   :  { %934 = vmatpush.msrb.mxu2 %v2302_v38 }
 0x74c   :  { %935 = vmatpush.msrb.mxu2 %v2307_v39 }
 0x74e   :  { %v595_v7 = vpop.permute.xlu1 %594  ;;  %936 = vmatpush.msrb.mxu2 %v2318_v41 }
 0x74f   :  { %1883 = vmatmul.msk.f32.vlgmr.msra.gmra.mxu0 %vm180_vm4, %v595_v7 }
 0x750   :  { %937 = vmatpush.msrb.mxu2 %v2329_v43  ;;  %1032 = vmatpush.msra.mxu0 %v2251_v2 }
 0x751   :  { %1887 = vmatmul.msk.f32.vlgmr.msra.gmra.mxu2 %vm180_vm4, %v595_v7 }
 0x752   :  { %1033 = vmatpush.msra.mxu0 %v2256_v3  ;;  %1172 = vmatpush.msra.mxu2 %v2294_v36 }
 0x754   :  { %1034 = vmatpush.msra.mxu0 %v2265_v5  ;;  %1173 = vmatpush.msra.mxu2 %v2296_v37 }
 0x756   :  { %1035 = vmatpush.msra.mxu0 %v2271_v6  ;;  %1174 = vmatpush.msra.mxu2 %v2310_v40 }
 0x758   :  { %1175 = vmatpush.msra.mxu2 %v2321_v42 }
 0x7cc   :  { %v529_v10 = vpop.f32.mrf.mxu2  ;;  %v615_v13 = vpop.f32.mrf.mxu0 }
 0x7cd   :  { %v530_v12 = vadd.f32 %v2378_v52, %v529_v10 }
 0x7cf   :  { %v618_v15 = vadd.f32 %v615_v13, %v530_v12 }
 0x7d1   :  { %v1884_v16 = vmul.f32 -1.442695, %v618_v15 }
 0x7d3   :  { %1986 = vpow2.f32 %v1884_v16 }
 0x7d4   :  { %v713_v18 = vpop.f32.mrf.mxu2 }
 0x7d5   :  { %v716_v19 = vadd.f32 %v713_v18, %v165_v17 }
 0x7d7   :  { %v1888_v20 = vmul.f32 -1.442695, %v716_v19 }
 0x7d9   :  { %v1987_v21 = vpop.eup %1986  ;;  %1988 = vpow2.f32 %v1888_v20 }
 0x7da   :  { %v622_v22 = vadd.f32 1.0, %v1987_v21 }
 0x7dc   :  { %1990 = vrcp.f32 %v622_v22  ;;  %v634_v28 = vand.u32 2147483648, %v622_v22  ;;  %v632_v30 = vand.u32 2147483647, %v622_v22  ;;  %vm628_vm7 = vweird.f32 %v622_v22 }
 0x7de   :  { %v635_v35 = vor.u32 1.1754944e-38, %v634_v28  ;;  %vm633_vm9 = vcmp.eq.f32.partialorder %v632_v30, 8.507059e+37 }
 0x7df   :  { %v1989_v23 = vpop.eup %1988 }
 0x7e0   :  { %v720_v24 = vadd.f32 1.0, %v1989_v23 }
 0x7e2   :  { %v1991_v25 = vpop.eup %1990  ;;  %1992 = vrcp.f32 %v720_v24  ;;  %v732_v48 = vand.u32 2147483648, %v720_v24  ;;  %v730_v53 = vand.u32 2147483647, %v720_v24  ;;  %vm726_vm11 = vweird.f32 %v720_v24 }
 0x7e3   :  { %v624_v26 = vmul.f32 %v1991_v25, %v622_v22  ;;  %vm629_vm6 = vweird.f32 %v1991_v25 }
 0x7e4   :  { %vm630_vm8 = vmor %vm628_vm7, %vm629_vm6  ;;  %v733_v34 = vor.u32 1.1754944e-38, %v732_v48  ;;  %vm731_vm13 = vcmp.eq.f32.partialorder %v730_v53, 8.507059e+37 }
 0x7e5   :  { %v625_v27 = vsub.f32 1.0, %v624_v26 }
 0x7e7   :  { %v626_v29 = vmul.f32 %v1991_v25, %v625_v27 }
 0x7e8   :  { %v1993_v31 = vpop.eup %1992 }
 0x7e9   :  { %v722_v32 = vmul.f32 %v1993_v31, %v720_v24  ;;  %v627_v33 = vadd.f32 %v1991_v25, %v626_v29  ;;  %vm727_vm10 = vweird.f32 %v1993_v31 }
 0x7ea   :  { %vm728_vm12 = vmor %vm726_vm11, %vm727_vm10 }
 0x7eb   :  { %v723_v44 = vsub.f32 1.0, %v722_v32  ;;  %v631_v46 = vsel %vm630_vm8, %v1991_v25, %v627_v33 }
 0x7ec   :  { %v636_v47 = vsel %vm633_vm9, %v635_v35, %v631_v46 }
 0x7ed   :  { %v638_v50 = vmul.f32 2.0, %v636_v47  ;;  %v724_v51 = vmul.f32 %v1993_v31, %v723_v44  ;;  %v640_v4 = vmul.f32 %v636_v47, %v2425_v57  ;;  %v102_v57 = vld [vmem:[%s2776_s0 + $0x20] sm:$0xff] }
 0x7ef   :  { %v1885_v54 = vadd.f32 -1.0, %v638_v50  ;;  %v725_v55 = vadd.f32 %v1993_v31, %v724_v51 }
 0x7f1   :  { %642 = vrot.lane.b32.xlu0 %v1885_v54, %s2175_s23  ;;  %v729_v58 = vsel %vm728_vm12, %v1993_v31, %v725_v55 }
 0x7f2   :  { %v734_v59 = vsel %vm731_vm13, %v733_v34, %v729_v58 }
 0x7f3   :  { %v736_v60 = vmul.f32 2.0, %v734_v59  ;;  %v738_v12 = vmul.f32 %v734_v59, %v2430_v61 }
 0x7f5   :  { %v1889_v62 = vadd.f32 -1.0, %v736_v60 }
 0x7f7   :  { %740 = vrot.lane.b32.xlu1 %v1889_v62, %s2175_s23 }
 0x863   :  { %v643_v45 = vpop.permute.xlu0 %642 }
 0x864   :  { %v645_v63 = vmul.f32 %v643_v45, %v636_v47 }
 0x866   :  { %647 = vrot.lane.b32.xlu2 %v645_v63, %s2176_s24 }
 0x869   :  { %v741_v49 = vpop.permute.xlu1 %740 }
 0x86a   :  { %v743_v1 = vmul.f32 %v741_v49, %v734_v59 }
 0x86c   :  { %745 = vrot.lane.b32.xlu0 %v743_v1, %s2176_s24 }
 0x8c0   :  { %v648_v7 = vpop.permute.xlu2 %647 }
 0x8c1   :  { %v2465_v9 = vadd.f32 %v648_v7, %v640_v4 }
 0x8c3   :  { %1994 = vtanh.f32 %v2465_v9 }
 0x8c9   :  { %v1995_v10 = vpop.eup %1994 }
 0x8ca   :  { %653 = vrot.lane.b32.xlu1 %v1995_v10, %s2175_s23 }
 0x8de   :  { %v746_v13 = vpop.permute.xlu0 %745 }
 0x8df   :  { %v2470_v14 = vadd.f32 %v746_v13, %v738_v12 }
 0x8e1   :  { %1996 = vtanh.f32 %v2470_v14 }
 0x8e7   :  { %v1997_v15 = vpop.eup %1996 }
 0x8e8   :  { %751 = vrot.lane.b32.xlu2 %v1997_v15, %s2175_s23 }
 0x8f0   :  { %129 = vperm.xlu2 %1948, %v102_v57  }
 0x93c   :  { %v654_v16 = vpop.permute.xlu1 %653 }
 0x93d   :  { %v2477_v17 = vmul.f32 %v654_v16, %v636_v47 }
 0x93f   :  { %670 = vrot.lane.b32.xlu0 %v2477_v17, %s2176_s24 }
 0x942   :  { %v752_v61 = vpop.permute.xlu2 %751 }
 0x943   :  { %v754_v18 = vmul.f32 %v752_v61, %v734_v59 }
 0x945   :  { %756 = vrot.lane.b32.xlu1 %v754_v18, %s2176_s24 }
 0x94a   :  { %v130_v21 = vpop.permute.xlu2 %129 }
 0x94b   :  { %v154_v23 = vmul.f32 %v2279_v8, %v130_v21 }
 0x94d   :  { %v166_v24 = vadd.f32 %v2285_v11, %v154_v23 }
 0x9b1   :  { %v671_v19 = vpop.permute.xlu0 %670 }
 0x9b2   :  { %1886 = vmatmul.msk.f32.vlgmr.msra.gmra.mxu1 %vm180_vm4, %v671_v19 }
 0x9b3   :  { %1096 = vmatpush.msra.mxu1 %v2302_v38 }
 0x9b5   :  { %1097 = vmatpush.msra.mxu1 %v2307_v39 }
 0x9b7   :  { %v757_v20 = vpop.permute.xlu1 %756  ;;  %1098 = vmatpush.msra.mxu1 %v2318_v41 }
 0x9b8   :  { %1890 = vmatmul.msk.f32.vlgmr.msra.gmra.mxu3 %vm180_vm4, %v757_v20 }
 0x9b9   :  { %1194 = vmatpush.msra.mxu3 %v2251_v2  ;;  %1099 = vmatpush.msra.mxu1 %v2329_v43 }
 0x9ba   :  { %1894 = vmatmul.msk.f32.vlgmr.msrb.gmra.mxu1 %vm180_vm4, %v757_v20 }
 0x9bb   :  { %1195 = vmatpush.msra.mxu3 %v2256_v3  ;;  %1334 = vmatpush.msrb.mxu1 %v2294_v36 }
 0x9bd   :  { %1196 = vmatpush.msra.mxu3 %v2265_v5  ;;  %1335 = vmatpush.msrb.mxu1 %v2296_v37 }
 0x9bf   :  { %1197 = vmatpush.msra.mxu3 %v2271_v6  ;;  %1336 = vmatpush.msrb.mxu1 %v2310_v40 }
 0x9c1   :  { %1337 = vmatpush.msrb.mxu1 %v2321_v42 }
 0xa2f   :  { %v691_v22 = vpop.f32.mrf.mxu1 }
 0xa30   :  { %v692_v27 = vadd.f32 %v2378_v52, %v691_v22 }
 0xa37   :  { %v875_v25 = vpop.f32.mrf.mxu1 }
 0xa38   :  { %v878_v26 = vadd.f32 %v875_v25, %v166_v24 }
 0xa3a   :  { %v1895_v28 = vmul.f32 -1.442695, %v878_v26 }
 0xa3b   :  { %v777_v29 = vpop.f32.mrf.mxu3 }
 0xa3c   :  { %1998 = vpow2.f32 %v1895_v28  ;;  %v780_v30 = vadd.f32 %v777_v29, %v692_v27 }
 0xa3e   :  { %v1891_v31 = vmul.f32 -1.442695, %v780_v30 }
 0xa40   :  { %2000 = vpow2.f32 %v1891_v31 }
 0xa42   :  { %v1999_v32 = vpop.eup %1998 }
 0xa43   :  { %v882_v33 = vadd.f32 1.0, %v1999_v32 }
 0xa45   :  { %2002 = vrcp.f32 %v882_v33  ;;  %v892_v51 = vand.u32 2147483647, %v882_v33  ;;  %v894_v53 = vand.u32 2147483648, %v882_v33  ;;  %vm888_vm15 = vweird.f32 %v882_v33 }
 0xa46   :  { %v2001_v35 = vpop.eup %2000 }
 0xa47   :  { %v784_v44 = vadd.f32 1.0, %v2001_v35  ;;  %vm893_vm1 = vcmp.eq.f32.partialorder %v892_v51, 8.507059e+37  ;;  %v895_v59 = vor.u32 1.1754944e-38, %v894_v53 }
 0xa49   :  { %2004 = vrcp.f32 %v784_v44  ;;  %v796_v60 = vand.u32 2147483648, %v784_v44  ;;  %v794_v63 = vand.u32 2147483647, %v784_v44  ;;  %vm790_vm3 = vweird.f32 %v784_v44 }
 0xa4b   :  { %v2003_v46 = vpop.eup %2002  ;;  %v797_v7 = vor.u32 1.1754944e-38, %v796_v60  ;;  %vm795_vm6 = vcmp.eq.f32.partialorder %v794_v63, 8.507059e+37 }
 0xa4c   :  { %v884_v47 = vmul.f32 %v2003_v46, %v882_v33  ;;  %vm889_vm14 = vweird.f32 %v2003_v46 }
 0xa4d   :  { %vm890_vm0 = vmor %vm888_vm15, %vm889_vm14 }
 0xa4e   :  { %v885_v48 = vsub.f32 1.0, %v884_v47 }
 0xa4f   :  { %v2005_v50 = vpop.eup %2004 }
 0xa50   :  { %v786_v54 = vmul.f32 %v2005_v50, %v784_v44  ;;  %v886_v55 = vmul.f32 %v2003_v46, %v885_v48  ;;  %vm791_vm2 = vweird.f32 %v2005_v50 }
 0xa51   :  { %vm792_vm5 = vmor %vm790_vm3, %vm791_vm2 }
 0xa52   :  { %v787_v34 = vsub.f32 1.0, %v786_v54  ;;  %v887_v58 = vadd.f32 %v2003_v46, %v886_v55 }
 0xa54   :  { %v891_v62 = vsel %vm890_vm0, %v2003_v46, %v887_v58  ;;  %v788_v45 = vmul.f32 %v2005_v50, %v787_v34 }
 0xa55   :  { %v896_v49 = vsel %vm893_vm1, %v895_v59, %v891_v62 }
 0xa56   :  { %v898_v1 = vmul.f32 2.0, %v896_v49  ;;  %v789_v4 = vadd.f32 %v2005_v50, %v788_v45  ;;  %v900_v20 = vmul.f32 %v896_v49, %v2470_v14  ;;  %v103_v14 = vld [vmem:[%s2776_s0 + $0x28] sm:$0xff] }
 0xa58   :  { %v1896_v10 = vadd.f32 -1.0, %v898_v1  ;;  %v793_v12 = vsel %vm792_vm5, %v2005_v50, %v789_v4 }
 0xa59   :  { %v798_v13 = vsel %vm795_vm6, %v797_v7, %v793_v12 }
 0xa5a   :  { %902 = vrot.lane.b32.xlu0 %v1896_v10, %s2175_s23  ;;  %v800_v15 = vmul.f32 2.0, %v798_v13  ;;  %v802_v24 = vmul.f32 %v798_v13, %v2465_v9 }
 0xa5c   :  { %v1892_v57 = vadd.f32 -1.0, %v800_v15 }
 0xa5e   :  { %804 = vrot.lane.b32.xlu1 %v1892_v57, %s2175_s23 }
 0xacc   :  { %v903_v16 = vpop.permute.xlu0 %902 }
 0xacd   :  { %v905_v61 = vmul.f32 %v903_v16, %v896_v49 }
 0xacf   :  { %907 = vrot.lane.b32.xlu2 %v905_v61, %s2176_s24 }
 0xad0   :  { %v805_v18 = vpop.permute.xlu1 %804 }
 0xad1   :  { %v807_v19 = vmul.f32 %v805_v18, %v798_v13 }
 0xad3   :  { %809 = vrot.lane.b32.xlu0 %v807_v19, %s2176_s24 }
 0xb29   :  { %v908_v21 = vpop.permute.xlu2 %907 }
 0xb2a   :  { %v2505_v22 = vadd.f32 %v908_v21, %v900_v20 }
 0xb2c   :  { %2006 = vtanh.f32 %v2505_v22 }
 0xb32   :  { %v2007_v23 = vpop.eup %2006 }
 0xb33   :  { %913 = vrot.lane.b32.xlu1 %v2007_v23, %s2175_s23 }
 0xb45   :  { %v810_v25 = vpop.permute.xlu0 %809 }
 0xb46   :  { %v2510_v26 = vadd.f32 %v810_v25, %v802_v24 }
 0xb48   :  { %2008 = vtanh.f32 %v2510_v26 }
 0xb4e   :  { %v2009_v27 = vpop.eup %2008 }
 0xb4f   :  { %815 = vrot.lane.b32.xlu2 %v2009_v27, %s2175_s23 }
 0xb57   :  { %134 = vperm.xlu2 %1948, %v103_v14  }
 0xba5   :  { %v914_v28 = vpop.permute.xlu1 %913 }
 0xba6   :  { %v916_v29 = vmul.f32 %v914_v28, %v896_v49 }
 0xba8   :  { %918 = vrot.lane.b32.xlu0 %v916_v29, %s2176_s24 }
 0xba9   :  { %v816_v30 = vpop.permute.xlu2 %815 }
 0xbaa   :  { %v2518_v31 = vmul.f32 %v816_v30, %v798_v13 }
 0xbac   :  { %832 = vrot.lane.b32.xlu1 %v2518_v31, %s2176_s24 }
 0xc1a   :  { %v919_v9 = vpop.permute.xlu0 %918 }
 0xc1b   :  { %1897 = vmatmul.msk.f32.vlgmr.msrb.gmra.mxu2 %vm180_vm4, %v919_v9 }
 0xc1c   :  { %1356 = vmatpush.msrb.mxu2 %v2251_v2  ;;  %v135_v2 = vpop.permute.xlu2 %134 }
 0xc1e   :  { %v833_v32 = vpop.permute.xlu1 %832  ;;  %1357 = vmatpush.msrb.mxu2 %v2256_v3 }
 0xc1f   :  { %1893 = vmatmul.msk.f32.vlgmr.msrb.gmra.mxu0 %vm180_vm4, %v833_v32  ;;  %v2572_v32 = vld [vmem:[%s2780_s4 + $0x10] sm:$0xff] }
 0xc20   :  { %1258 = vmatpush.msrb.mxu0 %v2302_v38  ;;  %1358 = vmatpush.msrb.mxu2 %v2265_v5 }
 0xc22   :  { %1259 = vmatpush.msrb.mxu0 %v2307_v39  ;;  %1359 = vmatpush.msrb.mxu2 %v2271_v6  ;;  %v155_v6 = vmul.f32 %v2279_v8, %v135_v2 }
 0xc24   :  { %1260 = vmatpush.msrb.mxu0 %v2318_v41 }
 0xc26   :  { %1261 = vmatpush.msrb.mxu0 %v2329_v43  ;;  %v167_v43 = vadd.f32 %v2285_v11, %v155_v6 }
 0xc27   :  { %1901 = vmatmul.msk.f32.vlgmr.msra.gmra.mxu0 %vm180_vm4, %v919_v9  ;;  %v2566_v9 = vld [vmem:[%s2780_s4 + $0x18] sm:$0xff] }
 0xc28   :  { %1496 = vmatpush.msra.mxu0 %v2294_v36 }
 0xc2a   :  { %1497 = vmatpush.msra.mxu0 %v2296_v37 }
 0xc2c   :  { %1498 = vmatpush.msra.mxu0 %v2310_v40 }
 0xc2e   :  { %1499 = vmatpush.msra.mxu0 %v2321_v42 }
 0xc9c   :  { %v853_v3 = vpop.f32.mrf.mxu0 }
 0xc9d   :  { %v854_v5 = vadd.f32 %v2378_v52, %v853_v3  ;;  %v2578_v3 = vld [vmem:[%s2780_s4 + $0x8] sm:$0xff] }
 0xc9e   :  { %v939_v38 = vpop.f32.mrf.mxu2 }
 0xc9f   :  { %v942_v39 = vadd.f32 %v939_v38, %v854_v5  ;;  %v2585_v5 = vld [vmem:[%s2780_s4] sm:$0xff] }
 0xca1   :  { %v1898_v41 = vmul.f32 -1.442695, %v942_v39 }
 0xca3   :  { %2010 = vpow2.f32 %v1898_v41 }
 0xca4   :  { %v1037_v33 = vpop.f32.mrf.mxu0 }
 0xca5   :  { %v1040_v36 = vadd.f32 %v1037_v33, %v167_v43  ;;  %v2597_v43 = vld [vmem:[%s2777_s1] ss:$0 sm:$0xff] }
 0xca7   :  { %v1902_v35 = vmul.f32 -1.442695, %v1040_v36 }
 0xca9   :  { %v2011_v37 = vpop.eup %2010  ;;  %2012 = vpow2.f32 %v1902_v35 }
 0xcaa   :  { %v946_v40 = vadd.f32 1.0, %v2011_v37  ;;  %v2603_v37 = vld [vmem:[%s2779_s3] ss:$0 sm:$0xff] }
 0xcac   :  { %2014 = vrcp.f32 %v946_v40  ;;  %v958_v50 = vand.u32 2147483648, %v946_v40  ;;  %v956_v51 = vand.u32 2147483647, %v946_v40  ;;  %vm952_vm8 = vweird.f32 %v946_v40 }
 0xcae   :  { %v959_v55 = vor.u32 1.1754944e-38, %v958_v50  ;;  %vm957_vm10 = vcmp.eq.f32.partialorder %v956_v51, 8.507059e+37 }
 0xcaf   :  { %v2013_v42 = vpop.eup %2012 }
 0xcb0   :  { %v1044_v44 = vadd.f32 1.0, %v2013_v42 }
 0xcb2   :  { %v2015_v46 = vpop.eup %2014  ;;  %2016 = vrcp.f32 %v1044_v44  ;;  %v1056_v60 = vand.u32 2147483648, %v1044_v44  ;;  %v1054_v63 = vand.u32 2147483647, %v1044_v44  ;;  %vm1050_vm12 = vweird.f32 %v1044_v44 }
 0xcb3   :  { %v948_v47 = vmul.f32 %v2015_v46, %v946_v40  ;;  %vm953_vm7 = vweird.f32 %v2015_v46 }
 0xcb4   :  { %vm954_vm9 = vmor %vm952_vm8, %vm953_vm7  ;;  %v1057_v4 = vor.u32 1.1754944e-38, %v1056_v60  ;;  %vm1055_vm14 = vcmp.eq.f32.partialorder %v1054_v63, 8.507059e+37 }
 0xcb5   :  { %v949_v48 = vsub.f32 1.0, %v948_v47 }
 0xcb7   :  { %v950_v8 = vmul.f32 %v2015_v46, %v949_v48 }
 0xcb8   :  { %v2017_v53 = vpop.eup %2016 }
 0xcb9   :  { %v1046_v54 = vmul.f32 %v2017_v53, %v1044_v44  ;;  %v951_v11 = vadd.f32 %v2015_v46, %v950_v8  ;;  %vm1051_vm11 = vweird.f32 %v2017_v53 }
 0xcba   :  { %vm1052_vm13 = vmor %vm1050_vm12, %vm1051_vm11 }
 0xcbb   :  { %v1047_v34 = vsub.f32 1.0, %v1046_v54  ;;  %v955_v58 = vsel %vm954_vm9, %v2015_v46, %v951_v11 }
 0xcbc   :  { %v960_v59 = vsel %vm957_vm10, %v959_v55, %v955_v58 }
 0xcbd   :  { %v962_v62 = vmul.f32 2.0, %v960_v59  ;;  %v1048_v45 = vmul.f32 %v2017_v53, %v1047_v34  ;;  %v964_v18 = vmul.f32 %v960_v59, %v2510_v26  ;;  %v104_v26 = vld [vmem:[%s2776_s0 + $0x30] sm:$0xff] }
 0xcbf   :  { %v1899_v49 = vadd.f32 -1.0, %v962_v62  ;;  %v1049_v1 = vadd.f32 %v2017_v53, %v1048_v45 }
 0xcc1   :  { %966 = vrot.lane.b32.xlu0 %v1899_v49, %s2175_s23  ;;  %v1053_v7 = vsel %vm1052_vm13, %v2017_v53, %v1049_v1 }
 0xcc2   :  { %v1058_v10 = vsel %vm1055_vm14, %v1057_v4, %v1053_v7 }
 0xcc3   :  { %v1060_v12 = vmul.f32 2.0, %v1058_v10  ;;  %v1062_v23 = vmul.f32 %v1058_v10, %v2505_v22 }
 0xcc5   :  { %v1903_v13 = vadd.f32 -1.0, %v1060_v12 }
 0xcc7   :  { %1064 = vrot.lane.b32.xlu1 %v1903_v13, %s2175_s23 }
 0xd33   :  { %v967_v15 = vpop.permute.xlu0 %966 }
 0xd34   :  { %v969_v57 = vmul.f32 %v967_v15, %v960_v59 }
 0xd36   :  { %971 = vrot.lane.b32.xlu2 %v969_v57, %s2176_s24 }
 0xd39   :  { %v1065_v16 = vpop.permute.xlu1 %1064 }
 0xd3a   :  { %v1067_v61 = vmul.f32 %v1065_v16, %v1058_v10 }
 0xd3c   :  { %1069 = vrot.lane.b32.xlu0 %v1067_v61, %s2176_s24 }
 0xd90   :  { %v972_v19 = vpop.permute.xlu2 %971 }
 0xd91   :  { %v2545_v20 = vadd.f32 %v972_v19, %v964_v18 }
 0xd93   :  { %2018 = vtanh.f32 %v2545_v20 }
 0xd99   :  { %v2019_v21 = vpop.eup %2018 }
 0xd9a   :  { %977 = vrot.lane.b32.xlu1 %v2019_v21, %s2175_s23 }
 0xdae   :  { %v1070_v24 = vpop.permute.xlu0 %1069 }
 0xdaf   :  { %v2550_v25 = vadd.f32 %v1070_v24, %v1062_v23 }
 0xdb1   :  { %2020 = vtanh.f32 %v2550_v25 }
 0xdb7   :  { %v2021_v27 = vpop.eup %2020 }
 0xdb8   :  { %1075 = vrot.lane.b32.xlu2 %v2021_v27, %s2175_s23 }
 0xdc0   :  { %139 = vperm.xlu2 %1948, %v104_v26  }
 0xe0c   :  { %v978_v14 = vpop.permute.xlu1 %977 }
 0xe0d   :  { %v2557_v28 = vmul.f32 %v978_v14, %v960_v59 }
 0xe0f   :  { %994 = vrot.lane.b32.xlu0 %v2557_v28, %s2176_s24 }
 0xe12   :  { %v1076_v22 = vpop.permute.xlu2 %1075 }
 0xe13   :  { %v1078_v29 = vmul.f32 %v1076_v22, %v1058_v10 }
 0xe15   :  { %1080 = vrot.lane.b32.xlu1 %v1078_v29, %s2176_s24 }
 0xe1a   :  { %v140_v38 = vpop.permute.xlu2 %139 }
 0xe1b   :  { %v156_v33 = vmul.f32 %v2597_v43, %v140_v38 }
 0xe1d   :  { %v168_v40 = vadd.f32 %v2603_v37, %v156_v33  ;;  %v2082_v33 = vld [vmem:[%s2778_s2 + $0x18] sm:$0xff] }
 0xe81   :  { %v995_v30 = vpop.permute.xlu0 %994 }
 0xe82   :  { %1900 = vmatmul.msk.f32.vlgmr.msrb.gmra.mxu3 %vm180_vm4, %v995_v30 }
 0xe83   :  { %1420 = vmatpush.msrb.mxu3 %v2566_v9 }
 0xe85   :  { %1421 = vmatpush.msrb.mxu3 %v2572_v32 }
 0xe87   :  { %v1081_v2 = vpop.permute.xlu1 %1080  ;;  %1422 = vmatpush.msrb.mxu3 %v2578_v3 }
 0xe88   :  { %1904 = vmatmul.msk.f32.vlgmr.msra.gmra.mxu1 %vm180_vm4, %v1081_v2 }
 0xe89   :  { %1423 = vmatpush.msrb.mxu3 %v2585_v5 }
 0xe8a   :  { %1908 = vmatmul.msk.f32.vlgmr.msra.gmra.mxu3 %vm180_vm4, %v1081_v2 }
 0xe8b   :  { %1600 = vmatpush.msra.mxu3 %v2566_v9 }
 0xe8d   :  { %1601 = vmatpush.msra.mxu3 %v2572_v32 }
 0xe8f   :  { %1602 = vmatpush.msra.mxu3 %v2578_v3 }
 0xe91   :  { %1603 = vmatpush.msra.mxu3 %v2585_v5 }
 0xf05   :  { %v1015_v6 = vpop.f32.mrf.mxu3  ;;  %v1101_v41 = vpop.f32.mrf.mxu1 }
 0xf06   :  { %v1016_v39 = vadd.f32 %v2378_v52, %v1015_v6 }
 0xf08   :  { %v1104_v36 = vadd.f32 %v1101_v41, %v1016_v39 }
 0xf0a   :  { %v1905_v35 = vmul.f32 -1.442695, %v1104_v36  ;;  %v2083_v36 = vld [vmem:[%s2778_s2 + $0x10] sm:$0xff] }
 0xf0c   :  { %2022 = vpow2.f32 %v1905_v35 }
 0xf0d   :  { %v1199_v42 = vpop.f32.mrf.mxu3 }
 0xf0e   :  { %v1202_v52 = vadd.f32 %v1199_v42, %v168_v40  ;;  %v2084_v40 = vld [vmem:[%s2778_s2 + $0x8] sm:$0xff]  ;;  %v2085_v42 = vld [vmem:[%s2778_s2] sm:$0xff] }
 0xf10   :  { %v1909_v44 = vmul.f32 -1.442695, %v1202_v52  ;;  %v2086_v52 = vld [vmem:[#allocation4 + $0x18] sm:$0xff] }
 0xf12   :  { %v2023_v46 = vpop.eup %2022  ;;  %2024 = vpow2.f32 %v1909_v44  ;;  %v2087_v44 = vld [vmem:[#allocation4 + $0x10] sm:$0xff] }
 0xf13   :  { %v1108_v47 = vadd.f32 1.0, %v2023_v46  ;;  %v2088_v46 = vld [vmem:[#allocation4 + $0x8] sm:$0xff] }
 0xf15   :  { %2026 = vrcp.f32 %v1108_v47  ;;  %v1120_v54 = vand.u32 2147483648, %v1108_v47  ;;  %v1118_v55 = vand.u32 2147483647, %v1108_v47  ;;  %vm1114_vm0 = vweird.f32 %v1108_v47 }
 0xf17   :  { %v1121_v60 = vor.u32 1.1754944e-38, %v1120_v54  ;;  %vm1119_vm2 = vcmp.eq.f32.partialorder %v1118_v55, 8.507059e+37 }
 0xf18   :  { %v2025_v48 = vpop.eup %2024 }
 0xf19   :  { %v1206_v50 = vadd.f32 1.0, %v2025_v48 }
 0xf1b   :  { %v2027_v8 = vpop.eup %2026  ;;  %2028 = vrcp.f32 %v1206_v50  ;;  %v1218_v49 = vand.u32 2147483648, %v1206_v50  ;;  %v1216_v7 = vand.u32 2147483647, %v1206_v50  ;;  %vm1212_vm5 = vweird.f32 %v1206_v50 }
 0xf1c   :  { %v1110_v51 = vmul.f32 %v2027_v8, %v1108_v47  ;;  %vm1115_vm15 = vweird.f32 %v2027_v8  ;;  %v2089_v47 = vld [vmem:[#allocation4] sm:$0xff] }
 0xf1d   :  { %vm1116_vm1 = vmor %vm1114_vm0, %vm1115_vm15  ;;  %v1219_v13 = vor.u32 1.1754944e-38, %v1218_v49  ;;  %vm1217_vm7 = vcmp.eq.f32.partialorder %v1216_v7, 8.507059e+37 }
 0xf1e   :  { %v1111_v53 = vsub.f32 1.0, %v1110_v51 }
 0xf20   :  { %v1112_v11 = vmul.f32 %v2027_v8, %v1111_v53 }
 0xf21   :  { %v2029_v34 = vpop.eup %2028 }
 0xf22   :  { %v1208_v58 = vmul.f32 %v2029_v34, %v1206_v50  ;;  %v1113_v59 = vadd.f32 %v2027_v8, %v1112_v11  ;;  %vm1213_vm3 = vweird.f32 %v2029_v34 }
 0xf23   :  { %vm1214_vm6 = vmor %vm1212_vm5, %vm1213_vm3 }
 0xf24   :  { %v1209_v62 = vsub.f32 1.0, %v1208_v58  ;;  %v1117_v45 = vsel %vm1116_vm1, %v2027_v8, %v1113_v59  ;;  %v2646_v8 = vld [vmem:[%s2782_s6] ss:$0 sm:$0xff] }
 0xf25   :  { %v1122_v63 = vsel %vm1119_vm2, %v1121_v60, %v1117_v45 }
 0xf26   :  { %v1124_v1 = vmul.f32 2.0, %v1122_v63  ;;  %v1210_v4 = vmul.f32 %v2029_v34, %v1209_v62  ;;  %v1126_v24 = vmul.f32 %v1122_v63, %v2545_v20  ;;  %v105_v20 = vld [vmem:[%s2776_s0 + $0x38] sm:$0xff] }
 0xf28   :  { %v1906_v10 = vadd.f32 -1.0, %v1124_v1  ;;  %v1211_v12 = vadd.f32 %v2029_v34, %v1210_v4 }
 0xf2a   :  { %1128 = vrot.lane.b32.xlu0 %v1906_v10, %s2175_s23  ;;  %v1215_v15 = vsel %vm1214_vm6, %v2029_v34, %v1211_v12 }
 0xf2b   :  { %v1220_v57 = vsel %vm1217_vm7, %v1219_v13, %v1215_v15 }
 0xf2c   :  { %v1222_v16 = vmul.f32 2.0, %v1220_v57  ;;  %v1224_v22 = vmul.f32 %v1220_v57, %v2550_v25 }
 0xf2e   :  { %v1910_v61 = vadd.f32 -1.0, %v1222_v16 }
 0xf30   :  { %1226 = vrot.lane.b32.xlu1 %v1910_v61, %s2175_s23 }
 0xf9c   :  { %v1129_v18 = vpop.permute.xlu0 %1128 }
 0xf9d   :  { %v1131_v19 = vmul.f32 %v1129_v18, %v1122_v63 }
 0xf9f   :  { %1133 = vrot.lane.b32.xlu2 %v1131_v19, %s2176_s24 }
 0xfa2   :  { %v1227_v21 = vpop.permute.xlu1 %1226 }
 0xfa3   :  { %v1229_v23 = vmul.f32 %v1227_v21, %v1220_v57 }
 0xfa5   :  { %1231 = vrot.lane.b32.xlu0 %v1229_v23, %s2176_s24 }
 0xff9   :  { %v1134_v27 = vpop.permute.xlu2 %1133 }
 0xffa   :  { %v2611_v26 = vadd.f32 %v1134_v27, %v1126_v24 }
 0xffc   :  { %2030 = vtanh.f32 %v2611_v26 }
0x1002   :  { %v2031_v14 = vpop.eup %2030 }
0x1003   :  { %1139 = vrot.lane.b32.xlu1 %v2031_v14, %s2175_s23 }
0x1017   :  { %v1232_v29 = vpop.permute.xlu0 %1231 }
0x1018   :  { %v2616_v30 = vadd.f32 %v1232_v29, %v1224_v22 }
0x101a   :  { %2032 = vtanh.f32 %v2616_v30 }
0x1020   :  { %v2033_v2 = vpop.eup %2032 }
0x1021   :  { %1237 = vrot.lane.b32.xlu2 %v2033_v2, %s2175_s23 }
0x1029   :  { %144 = vperm.xlu2 %1948, %v105_v20  }
0x1075   :  { %v1140_v38 = vpop.permute.xlu1 %1139 }
0x1076   :  { %v2623_v6 = vmul.f32 %v1140_v38, %v1122_v63 }
0x1078   :  { %1156 = vrot.lane.b32.xlu0 %v2623_v6, %s2176_s24 }
0x107b   :  { %v1238_v25 = vpop.permute.xlu2 %1237 }
0x107c   :  { %v1240_v39 = vmul.f32 %v1238_v25, %v1220_v57 }
0x107e   :  { %1242 = vrot.lane.b32.xlu1 %v1240_v39, %s2176_s24 }
0x1083   :  { %v145_v48 = vpop.permute.xlu2 %144 }
0x1084   :  { %v157_v54 = vmul.f32 %v2597_v43, %v145_v48 }
0x1086   :  { %v169_v34 = vadd.f32 %v2603_v37, %v157_v54 }
0x10ea   :  { %v1157_v41 = vpop.permute.xlu0 %1156 }
0x10eb   :  { %1907 = vmatmul.msk.f32.vlgmr.msra.gmra.mxu2 %vm180_vm4, %v1157_v41 }
0x10ec   :  { %1536 = vmatpush.msra.mxu2 %v2082_v33 }
0x10ee   :  { %1537 = vmatpush.msra.mxu2 %v2083_v36 }
0x10f0   :  { %v1243_v35 = vpop.permute.xlu1 %1242  ;;  %1538 = vmatpush.msra.mxu2 %v2084_v40 }
0x10f1   :  { %1911 = vmatmul.msk.f32.vlgmr.msrb.gmra.mxu0 %vm180_vm4, %v1243_v35 }
0x10f2   :  { %1539 = vmatpush.msra.mxu2 %v2085_v42  ;;  %1676 = vmatpush.msrb.mxu0 %v2086_v52 }
0x10f3   :  { %1915 = vmatmul.msk.f32.vlgmr.msrb.gmra.mxu2 %vm180_vm4, %v1243_v35 }
0x10f4   :  { %1716 = vmatpush.msrb.mxu2 %v2082_v33  ;;  %1677 = vmatpush.msrb.mxu0 %v2087_v44 }
0x10f6   :  { %1717 = vmatpush.msrb.mxu2 %v2083_v36  ;;  %1678 = vmatpush.msrb.mxu0 %v2088_v46 }
0x10f8   :  { %1718 = vmatpush.msrb.mxu2 %v2084_v40  ;;  %1679 = vmatpush.msrb.mxu0 %v2089_v47 }
0x10fa   :  { %1719 = vmatpush.msrb.mxu2 %v2085_v42 }
0x116e   :  { %v1177_v50 = vpop.f32.mrf.mxu2  ;;  %v1263_v53 = vpop.f32.mrf.mxu0 }
0x116f   :  { %v1178_v51 = vadd.f32 %v2646_v8, %v1177_v50 }
0x1171   :  { %v1266_v11 = vadd.f32 %v1263_v53, %v1178_v51 }
0x1173   :  { %v1912_v55 = vmul.f32 -1.442695, %v1266_v11 }
0x1175   :  { %2034 = vpow2.f32 %v1912_v55 }
0x1176   :  { %v1361_v58 = vpop.f32.mrf.mxu2 }
0x1177   :  { %v1364_v59 = vadd.f32 %v1361_v58, %v169_v34 }
0x1179   :  { %v1916_v60 = vmul.f32 -1.442695, %v1364_v59 }
0x117b   :  { %v2035_v62 = vpop.eup %2034  ;;  %2036 = vpow2.f32 %v1916_v60 }
0x117c   :  { %v1270_v45 = vadd.f32 1.0, %v2035_v62 }
0x117e   :  { %2038 = vrcp.f32 %v1270_v45  ;;  %v1282_v10 = vand.u32 2147483648, %v1270_v45  ;;  %v1280_v12 = vand.u32 2147483647, %v1270_v45  ;;  %vm1276_vm9 = vweird.f32 %v1270_v45 }
0x1180   :  { %v1283_v57 = vor.u32 1.1754944e-38, %v1282_v10  ;;  %vm1281_vm11 = vcmp.eq.f32.partialorder %v1280_v12, 8.507059e+37 }
0x1181   :  { %v2037_v63 = vpop.eup %2036 }
0x1182   :  { %v1368_v49 = vadd.f32 1.0, %v2037_v63 }
0x1184   :  { %v2039_v1 = vpop.eup %2038  ;;  %2040 = vrcp.f32 %v1368_v49  ;;  %v1380_v19 = vand.u32 2147483648, %v1368_v49  ;;  %v1378_v24 = vand.u32 2147483647, %v1368_v49  ;;  %vm1374_vm13 = vweird.f32 %v1368_v49 }
0x1185   :  { %v1272_v4 = vmul.f32 %v2039_v1, %v1270_v45  ;;  %vm1277_vm8 = vweird.f32 %v2039_v1 }
0x1186   :  { %vm1278_vm10 = vmor %vm1276_vm9, %vm1277_vm8  ;;  %v1381_v22 = vor.u32 1.1754944e-38, %v1380_v19  ;;  %vm1379_vm15 = vcmp.eq.f32.partialorder %v1378_v24, 8.507059e+37  ;;  %v85_v19 = vld [vmem:[#allocation7] sm:$0xff] }
0x1187   :  { %v1273_v7 = vsub.f32 1.0, %v1272_v4 }
0x1189   :  { %v1274_v43 = vmul.f32 %v2039_v1, %v1273_v7 }
0x118a   :  { %v2041_v13 = vpop.eup %2040 }
0x118b   :  { %v1370_v15 = vmul.f32 %v2041_v13, %v1368_v49  ;;  %v1275_v37 = vadd.f32 %v2039_v1, %v1274_v43  ;;  %vm1375_vm12 = vweird.f32 %v2041_v13 }
0x118c   :  { %vm1376_vm14 = vmor %vm1374_vm13, %vm1375_vm12 }
0x118d   :  { %v1371_v16 = vsub.f32 1.0, %v1370_v15  ;;  %v1279_v61 = vsel %vm1278_vm10, %v2039_v1, %v1275_v37 }
0x118e   :  { %v1284_v18 = vsel %vm1281_vm11, %v1283_v57, %v1279_v61  ;;  %v87_v61 = vld [vmem:[#allocation7 + $0x10] sm:$0xff] }
0x118f   :  { %v1286_v21 = vmul.f32 2.0, %v1284_v18  ;;  %v1372_v23 = vmul.f32 %v2041_v13, %v1371_v16  ;;  %v1288_v52 = vmul.f32 %v1284_v18, %v2611_v26  ;;  %v88_v16 = vld [vmem:[#allocation7 + $0x18] sm:$0xff] }
0x1190   :  { %1516 = vmatpush.msra.mxu1 %v88_v16 }
0x1191   :  { %v1913_v27 = vadd.f32 -1.0, %v1286_v21  ;;  %v1373_v14 = vadd.f32 %v2041_v13, %v1372_v23 }
0x1192   :  { %1517 = vmatpush.msra.mxu1 %v87_v61 }
0x1193   :  { %1290 = vrot.lane.b32.xlu1 %v1913_v27, %s2175_s23  ;;  %v1377_v29 = vsel %vm1376_vm14, %v2041_v13, %v1373_v14  ;;  %v2690_v27 = vld [vmem:[%s2784_s8] ss:$0 sm:$0xff] }
0x1194   :  { %v1382_v2 = vsel %vm1379_vm15, %v1381_v22, %v1377_v29 }
0x1195   :  { %v1384_v20 = vmul.f32 2.0, %v1382_v2  ;;  %v1386_v36 = vmul.f32 %v1382_v2, %v2616_v30 }
0x1197   :  { %v1917_v38 = vadd.f32 -1.0, %v1384_v20 }
0x1199   :  { %1388 = vrot.lane.b32.xlu0 %v1917_v38, %s2175_s23 }
0x1205   :  { %v1291_v25 = vpop.permute.xlu1 %1290 }
0x1206   :  { %v1293_v39 = vmul.f32 %v1291_v25, %v1284_v18 }
0x1208   :  { %1295 = vrot.lane.b32.xlu0 %v1293_v39, %s2176_s24 }
0x120b   :  { %v1389_v41 = vpop.permute.xlu0 %1388 }
0x120c   :  { %v1391_v33 = vmul.f32 %v1389_v41, %v1382_v2 }
0x120e   :  { %1393 = vrot.lane.b32.xlu2 %v1391_v33, %s2176_s24 }
0x1268   :  { %v1394_v35 = vpop.permute.xlu2 %1393 }
0x1269   :  { %v2656_v40 = vadd.f32 %v1394_v35, %v1386_v36 }
0x126b   :  { %2042 = vtanh.f32 %v2656_v40 }
0x1271   :  { %v2043_v42 = vpop.eup %2042 }
0x1272   :  { %1399 = vrot.lane.b32.xlu1 %v2043_v42, %s2175_s23 }
0x127a   :  { %v1296_v44 = vpop.permute.xlu0 %1295 }
0x127b   :  { %v1298_v46 = vadd.f32 %v1296_v44, %v1288_v52 }
0x127d   :  { %2044 = vtanh.f32 %v1298_v46 }
0x1283   :  { %v2045_v47 = vpop.eup %2044 }
0x1284   :  { %1301 = vrot.lane.b32.xlu2 %v2045_v47, %s2175_s23 }
0x12de   :  { %v1302_v48 = vpop.permute.xlu2 %1301 }
0x12df   :  { %v2662_v50 = vmul.f32 %v1302_v48, %v1284_v18  ;;  %v86_v18 = vld [vmem:[#allocation7 + $0x8] sm:$0xff] }
0x12e0   :  { %1518 = vmatpush.msra.mxu1 %v86_v18 }
0x12e1   :  { %1318 = vrot.lane.b32.xlu1 %v2662_v50, %s2176_s24 }
0x12e2   :  { %1519 = vmatpush.msra.mxu1 %v85_v19 }
0x12e4   :  { %v1400_v30 = vpop.permute.xlu1 %1399 }
0x12e5   :  { %v1402_v51 = vmul.f32 %v1400_v30, %v1382_v2 }
0x12e7   :  { %1404 = vrot.lane.b32.xlu0 %v1402_v51, %s2176_s24 }
0x1353   :  { %v1319_v53 = vpop.permute.xlu1 %1318 }
0x1354   :  { %1914 = vmatmul.msk.f32.vlgmr.msrb.gmra.mxu1 %vm180_vm4, %v1319_v53 }
0x1355   :  { %1696 = vmatpush.msrb.mxu1 %v88_v16 }
0x1357   :  { %1697 = vmatpush.msrb.mxu1 %v87_v61 }
0x1359   :  { %v1405_v26 = vpop.permute.xlu0 %1404  ;;  %1698 = vmatpush.msrb.mxu1 %v86_v18 }
0x135a   :  { %1918 = vmatmul.msk.f32.vlgmr.msrb.gmra.mxu3 %vm180_vm4, %v1405_v26  ;;  %1923 = vmatmul.msk.f32.vlgmr.msra.gmra.mxu2 %vm180_vm4, %v1405_v26 }
0x135b   :  { %1780 = vmatpush.msrb.mxu3 %v2566_v9  ;;  %1699 = vmatpush.msrb.mxu1 %v85_v19 }
0x135d   :  { %1781 = vmatpush.msrb.mxu3 %v2572_v32 }
0x135f   :  { %1782 = vmatpush.msrb.mxu3 %v2578_v3 }
0x1361   :  { %1783 = vmatpush.msrb.mxu3 %v2585_v5 }
0x13d1   :  { %v1339_v54 = vpop.f32.mrf.mxu1 }
0x13d2   :  { %v1340_v11 = vadd.f32 %v2646_v8, %v1339_v54 }
0x13dd   :  { %v1425_v55 = vpop.f32.mrf.mxu3  ;;  %v1541_v14 = vpop.f32.mrf.mxu2 }
0x13de   :  { %v1428_v34 = vadd.f32 %v1425_v55, %v1340_v11 }
0x13e0   :  { %v1919_v58 = vmul.f32 -1.442695, %v1428_v34 }
0x13e2   :  { %2046 = vpow2.f32 %v1919_v58 }
0x13e8   :  { %v2047_v59 = vpop.eup %2046 }
0x13e9   :  { %v1432_v60 = vadd.f32 1.0, %v2047_v59 }
0x13eb   :  { %2048 = vrcp.f32 %v1432_v60  ;;  %v1444_v9 = vand.u32 2147483648, %v1432_v60  ;;  %v1442_v32 = vand.u32 2147483647, %v1432_v60  ;;  %vm1438_vm1 = vweird.f32 %v1432_v60 }
0x13ed   :  { %v1445_v5 = vor.u32 1.1754944e-38, %v1444_v9  ;;  %vm1443_vm3 = vcmp.eq.f32.partialorder %v1442_v32, 8.507059e+37 }
0x13f1   :  { %v2049_v62 = vpop.eup %2048 }
0x13f2   :  { %v1434_v45 = vmul.f32 %v2049_v62, %v1432_v60  ;;  %vm1439_vm0 = vweird.f32 %v2049_v62 }
0x13f3   :  { %vm1440_vm2 = vmor %vm1438_vm1, %vm1439_vm0 }
0x13f4   :  { %v1435_v63 = vsub.f32 1.0, %v1434_v45 }
0x13f6   :  { %v1436_v49 = vmul.f32 %v2049_v62, %v1435_v63 }
0x13f8   :  { %v1437_v3 = vadd.f32 %v2049_v62, %v1436_v49 }
0x13fa   :  { %v1441_v1 = vsel %vm1440_vm2, %v2049_v62, %v1437_v3 }
0x13fb   :  { %v1446_v4 = vsel %vm1443_vm3, %v1445_v5, %v1441_v1 }
0x13fc   :  { %v1448_v7 = vmul.f32 2.0, %v1446_v4  ;;  %v1450_v13 = vmul.f32 %v1446_v4, %v1298_v46 }
0x13fe   :  { %v1920_v10 = vadd.f32 -1.0, %v1448_v7 }
0x1400   :  { %1452 = vrot.lane.b32.xlu2 %v1920_v10, %s2175_s23 }
0x145a   :  { %v1453_v43 = vpop.permute.xlu2 %1452 }
0x145b   :  { %v1455_v12 = vmul.f32 %v1453_v43, %v1446_v4 }
0x145d   :  { %1457 = vrot.lane.b32.xlu0 %v1455_v12, %s2176_s24 }
0x14cf   :  { %v1458_v15 = vpop.permute.xlu0 %1457 }
0x14d0   :  { %v2677_v37 = vadd.f32 %v1458_v15, %v1450_v13 }
0x14d2   :  { %2050 = vtanh.f32 %v2677_v37 }
0x14d8   :  { %v2051_v57 = vpop.eup %2050 }
0x14d9   :  { %1463 = vrot.lane.b32.xlu1 %v2051_v57, %s2175_s23 }
0x154b   :  { %v1464_v21 = vpop.permute.xlu1 %1463 }
0x154c   :  { %v2681_v23 = vmul.f32 %v1464_v21, %v1446_v4 }
0x154e   :  { %1480 = vrot.lane.b32.xlu2 %v2681_v23, %s2176_s24 }
0x15a8   :  { %v1481_v24 = vpop.permute.xlu2 %1480 }
0x15a9   :  { %1921 = vmatmul.msk.f32.vlgmr.msra.gmra.mxu0 %vm180_vm4, %v1481_v24  ;;  %1922 = vmatmul.msk.f32.vlgmr.msra.gmra.mxu1 %vm180_vm4, %v1481_v24 }
0x1626   :  { %v1521_v22 = vpop.f32.mrf.mxu1  ;;  %v1501_v60 = vpop.f32.mrf.mxu0 }
0x1627   :  { %v1542_v29 = vadd.f32 %v1541_v14, %v1521_v22 }
0x1629   :  { %v1544_v2 = vadd.f32 %v2690_v27, %v1542_v29 }
0x162b   :  { %v1924_v20 = vmul.f32 -1.442695, %v1544_v2 }
0x162d   :  { %2052 = vpow2.f32 %v1924_v20 }
0x1633   :  { %v2053_v38 = vpop.eup %2052 }
0x1634   :  { %v1548_v25 = vadd.f32 1.0, %v2053_v38 }
0x1636   :  { %2054 = vrcp.f32 %v1548_v25  ;;  %v1560_v36 = vand.u32 2147483648, %v1548_v25  ;;  %v1558_v42 = vand.u32 2147483647, %v1548_v25  ;;  %vm1554_vm6 = vweird.f32 %v1548_v25 }
0x1638   :  { %v1561_v44 = vor.u32 1.1754944e-38, %v1560_v36  ;;  %vm1559_vm8 = vcmp.eq.f32.partialorder %v1558_v42, 8.507059e+37 }
0x163c   :  { %v2055_v39 = vpop.eup %2054 }
0x163d   :  { %v1550_v41 = vmul.f32 %v2055_v39, %v1548_v25  ;;  %vm1555_vm5 = vweird.f32 %v2055_v39 }
0x163e   :  { %vm1556_vm7 = vmor %vm1554_vm6, %vm1555_vm5 }
0x163f   :  { %v1551_v33 = vsub.f32 1.0, %v1550_v41 }
0x1641   :  { %v1552_v35 = vmul.f32 %v2055_v39, %v1551_v33 }
0x1643   :  { %v1553_v52 = vadd.f32 %v2055_v39, %v1552_v35 }
0x1645   :  { %v1557_v46 = vsel %vm1556_vm7, %v2055_v39, %v1553_v52 }
0x1646   :  { %v1562_v47 = vsel %vm1559_vm8, %v1561_v44, %v1557_v46 }
0x1647   :  { %v1564_v48 = vmul.f32 2.0, %v1562_v47  ;;  %v1566_v26 = vmul.f32 %v1562_v47, %v2656_v40  ;;  %v1502_v40 = vadd.f32 %v2646_v8, %v1501_v60 }
0x1649   :  { %v1925_v30 = vadd.f32 -1.0, %v1564_v48 }
0x164b   :  { %1568 = vrot.lane.b32.xlu0 %v1925_v30, %s2175_s23 }
0x16bd   :  { %v1569_v51 = vpop.permute.xlu0 %1568 }
0x16be   :  { %v1571_v53 = vmul.f32 %v1569_v51, %v1562_v47 }
0x16c0   :  { %1573 = vrot.lane.b32.xlu1 %v1571_v53, %s2176_s24 }
0x1732   :  { %v1574_v54 = vpop.permute.xlu1 %1573 }
0x1733   :  { %v2696_v11 = vadd.f32 %v1574_v54, %v1566_v26  ;;  %v1954_v54 = vld [vmem:[%s2785_s9] ss:$0 sm:$0xff]  ;;  %s2178_s9 = smov [#allocation9]  }
0x1735   :  { %2056 = vtanh.f32 %v2696_v11 }
0x173b   :  { %v2057_v55 = vpop.eup %2056 }
0x173c   :  { %1579 = vrot.lane.b32.xlu2 %v2057_v55, %s2175_s23 }
0x1796   :  { %v1580_v34 = vpop.permute.xlu2 %1579 }
0x1797   :  { %v1582_v58 = vmul.f32 %v1580_v34, %v1562_v47 }
0x1799   :  { %1584 = vrot.lane.b32.xlu0 %v1582_v58, %s2176_s24 }
0x180b   :  { %v1585_v59 = vpop.permute.xlu0 %1584 }
0x180c   :  { %1926 = vmatmul.msk.f32.vlgmr.msra.gmra.mxu3 %vm180_vm4, %v1585_v59  ;;  %1931 = vmatmul.msk.f32.vlgmr.msrb.gmra.mxu2 %vm180_vm4, %v1585_v59 }
0x188f   :  { %v1605_v62 = vpop.f32.mrf.mxu3 }
0x1890   :  { %v1608_v45 = vadd.f32 %v1605_v62, %v1502_v40 }
0x1892   :  { %v1927_v63 = vmul.f32 -1.442695, %v1608_v45 }
0x1894   :  { %2058 = vpow2.f32 %v1927_v63 }
0x189a   :  { %v2059_v9 = vpop.eup %2058 }
0x189b   :  { %v1612_v49 = vadd.f32 1.0, %v2059_v9 }
0x189d   :  { %2060 = vrcp.f32 %v1612_v49  ;;  %v1624_v1 = vand.u32 2147483648, %v1612_v49  ;;  %v1622_v7 = vand.u32 2147483647, %v1612_v49  ;;  %vm1618_vm10 = vweird.f32 %v1612_v49 }
0x189f   :  { %v1625_v43 = vor.u32 1.1754944e-38, %v1624_v1  ;;  %vm1623_vm12 = vcmp.eq.f32.partialorder %v1622_v7, 8.507059e+37 }
0x18a3   :  { %v2061_v32 = vpop.eup %2060 }
0x18a4   :  { %v1614_v3 = vmul.f32 %v2061_v32, %v1612_v49  ;;  %vm1619_vm9 = vweird.f32 %v2061_v32 }
0x18a5   :  { %vm1620_vm11 = vmor %vm1618_vm10, %vm1619_vm9 }
0x18a6   :  { %v1615_v5 = vsub.f32 1.0, %v1614_v3 }
0x18a8   :  { %v1616_v4 = vmul.f32 %v2061_v32, %v1615_v5 }
0x18aa   :  { %v1617_v10 = vadd.f32 %v2061_v32, %v1616_v4 }
0x18ac   :  { %v1621_v12 = vsel %vm1620_vm11, %v2061_v32, %v1617_v10 }
0x18ad   :  { %v1626_v13 = vsel %vm1623_vm12, %v1625_v43, %v1621_v12 }
0x18ae   :  { %v1628_v15 = vmul.f32 2.0, %v1626_v13  ;;  %v1630_v18 = vmul.f32 %v1626_v13, %v2677_v37  ;;  %v1721_v37 = vpop.f32.mrf.mxu2 }
0x18b0   :  { %v1928_v57 = vadd.f32 -1.0, %v1628_v15 }
0x18b2   :  { %1632 = vrot.lane.b32.xlu1 %v1928_v57, %s2175_s23 }
0x1924   :  { %v1633_v16 = vpop.permute.xlu1 %1632 }
0x1925   :  { %v1635_v61 = vmul.f32 %v1633_v16, %v1626_v13 }
0x1927   :  { %1637 = vrot.lane.b32.xlu2 %v1635_v61, %s2176_s24 }
0x1981   :  { %v1638_v19 = vpop.permute.xlu2 %1637 }
0x1982   :  { %v2707_v21 = vadd.f32 %v1638_v19, %v1630_v18 }
0x1984   :  { %2062 = vtanh.f32 %v2707_v21 }
0x198a   :  { %v2063_v24 = vpop.eup %2062 }
0x198b   :  { %1643 = vrot.lane.b32.xlu0 %v2063_v24, %s2175_s23 }
0x19fd   :  { %v1644_v14 = vpop.permute.xlu0 %1643 }
0x19fe   :  { %v2711_v22 = vmul.f32 %v1644_v14, %v1626_v13 }
0x1a00   :  { %1660 = vrot.lane.b32.xlu1 %v2711_v22, %s2176_s24 }
0x1a72   :  { %v1661_v29 = vpop.permute.xlu1 %1660 }
0x1a73   :  { %1929 = vmatmul.msk.f32.vlgmr.msrb.gmra.mxu0 %vm180_vm4, %v1661_v29  ;;  %1930 = vmatmul.msk.f32.vlgmr.msrb.gmra.mxu1 %vm180_vm4, %v1661_v29 }
0x1af0   :  { %v1701_v2 = vpop.f32.mrf.mxu1  ;;  %v1681_v5 = vpop.f32.mrf.mxu0 }
0x1af1   :  { %v1722_v20 = vadd.f32 %v1721_v37, %v1701_v2  ;;  %v1682_v1 = vadd.f32 %v2646_v8, %v1681_v5 }
0x1af3   :  { %v1724_v38 = vadd.f32 %v2690_v27, %v1722_v20 }
0x1af5   :  { %v1932_v25 = vmul.f32 -1.442695, %v1724_v38 }
0x1af7   :  { %2064 = vpow2.f32 %v1932_v25 }
0x1afd   :  { %v2065_v39 = vpop.eup %2064 }
0x1afe   :  { %v1728_v41 = vadd.f32 1.0, %v2065_v39 }
0x1b00   :  { %2066 = vrcp.f32 %v1728_v41  ;;  %v1740_v42 = vand.u32 2147483648, %v1728_v41  ;;  %v1738_v44 = vand.u32 2147483647, %v1728_v41  ;;  %vm1734_vm14 = vweird.f32 %v1728_v41 }
0x1b02   :  { %v1741_v47 = vor.u32 1.1754944e-38, %v1740_v42  ;;  %vm1739_vm0 = vcmp.eq.f32.partialorder %v1738_v44, 8.507059e+37 }
0x1b06   :  { %v2067_v33 = vpop.eup %2066 }
0x1b07   :  { %v1730_v36 = vmul.f32 %v2067_v33, %v1728_v41  ;;  %vm1735_vm13 = vweird.f32 %v2067_v33 }
0x1b08   :  { %vm1736_vm15 = vmor %vm1734_vm14, %vm1735_vm13 }
0x1b09   :  { %v1731_v35 = vsub.f32 1.0, %v1730_v36 }
0x1b0b   :  { %v1732_v52 = vmul.f32 %v2067_v33, %v1731_v35 }
0x1b0d   :  { %v1733_v46 = vadd.f32 %v2067_v33, %v1732_v52 }
0x1b0f   :  { %v1737_v48 = vsel %vm1736_vm15, %v2067_v33, %v1733_v46 }
0x1b10   :  { %v1742_v30 = vsel %vm1739_vm0, %v1741_v47, %v1737_v48  ;;  %vm1847_vm0 = vcmask 80896  }
0x1b11   :  { %v1744_v27 = vmul.f32 2.0, %v1742_v30  ;;  %v1746_v55 = vmul.f32 %v1742_v30, %v2696_v11 }
0x1b13   :  { %v1933_v51 = vadd.f32 -1.0, %v1744_v27 }
0x1b15   :  { %1748 = vrot.lane.b32.xlu2 %v1933_v51, %s2175_s23 }
0x1b6f   :  { %v1749_v53 = vpop.permute.xlu2 %1748 }
0x1b70   :  { %v1751_v26 = vmul.f32 %v1749_v53, %v1742_v30  ;;  %v178_v53 = vlaneseq }
0x1b72   :  { %1753 = vrot.lane.b32.xlu0 %v1751_v26, %s2176_s24  ;;  %v179_v26 = vand.u32 127, %v178_v53 }
0x1b74   :  { %vm341_vm6 = vcmp.eq.s32.totalorder %v179_v26, 0  ;;  %vm503_vm7 = vcmp.eq.s32.totalorder %v179_v26, 1  ;;  %vm665_vm8 = vcmp.eq.s32.totalorder %v179_v26, 2  ;;  %vm827_vm9 = vcmp.eq.s32.totalorder %v179_v26, 3 }
0x1b75   :  { %vm989_vm10 = vcmp.eq.s32.totalorder %v179_v26, 4  ;;  %vm1151_vm11 = vcmp.eq.s32.totalorder %v179_v26, 5  ;;  %vm1313_vm12 = vcmp.eq.s32.totalorder %v179_v26, 6  ;;  %vm1475_vm13 = vcmp.eq.s32.totalorder %v179_v26, 7 }
0x1b76   :  { %vm1655_vm14 = vcmp.eq.s32.totalorder %v179_v26, 8  ;;  %vm1835_vm15 = vcmp.eq.s32.totalorder %v179_v26, 9 }
0x1b7a   :  { %330 = vrot.lane.b32.xlu0 %v1954_v54, %s2177_s28 }
0x1be4   :  { %v1754_v34 = vpop.permute.xlu0 %1753 }
0x1be5   :  { %v1756_v58 = vadd.f32 %v1754_v34, %v1746_v55 }
0x1be7   :  { %2068 = vtanh.f32 %v1756_v58 }
0x1bec   :  { %v2725_v60 = vpop.permute.xlu0 %330 }
0x1bed   :  { %v2069_v59 = vpop.eup %2068  ;;  %v333_v40 = vmul.f32 %v2725_v60, %v2398_v56  ;;  %v495_v62 = vmul.f32 %v2437_v0, %v2725_v60  ;;  %v657_v11 = vmul.f32 %v2477_v17, %v2725_v60  ;;  %v981_v0 = vmul.f32 %v2557_v28, %v2725_v60 }
0x1bee   :  { %1759 = vrot.lane.b32.xlu1 %v2069_v59, %s2175_s23  ;;  %v819_v2 = vmul.f32 %v2518_v31, %v2725_v60  ;;  %v1647_v33 = vmul.f32 %v2711_v22, %v2725_v60  ;;  %v1143_v48 = vmul.f32 %v2623_v6, %v2725_v60  ;;  %v1467_v51 = vmul.f32 %v2681_v23, %v2725_v60 }
0x1bf6   :  { %335 = vrot.lane.b32.xlu1 %v333_v40, %s2176_s24 }
0x1bfe   :  { %497 = vrot.lane.b32.xlu1 %v495_v62, %s2176_s24 }
0x1c06   :  { %659 = vrot.lane.b32.xlu1 %v657_v11, %s2176_s24 }
0x1c60   :  { %v1760_v45 = vpop.permute.xlu1 %1759 }
0x1c61   :  { %v1762_v63 = vmul.f32 %v1760_v45, %v1742_v30  ;;  %v1305_v30 = vmul.f32 %v2662_v50, %v2725_v60 }
0x1c63   :  { %1764 = vrot.lane.b32.xlu2 %v1762_v63, %s2176_s24 }
0x1c68   :  { %v336_v9 = vpop.permute.xlu1 %335 }
0x1c69   :  { %v338_v3 = vsel %vm180_vm4, %v336_v9, 0.0 }
0x1c70   :  { %v498_v49 = vpop.permute.xlu1 %497 }
0x1c71   :  { %v500_v37 = vsel %vm180_vm4, %v498_v49, 0.0 }
0x1c78   :  { %v660_v32 = vpop.permute.xlu1 %659 }
0x1c79   :  { %v662_v56 = vsel %vm180_vm4, %v660_v32, 0.0  ;;  %v1955_v32 = vld [vmem:[#allocation3] ss:$0 sm:$0xff] }
0x1c7a   :  { %663 = vadd.xlane.f32.xlu1 %v662_v56 }
0x1c8c   :  { %339 = vadd.xlane.f32.xlu2 %v338_v3 }
0x1c93   :  { %983 = vrot.lane.b32.xlu1 %v981_v0, %s2176_s24 }
0x1cbd   :  { %v1765_v17 = vpop.permute.xlu2 %1764 }
0x1cbe   :  { %1934 = vmatmul.msk.f32.vlgmr.msrb.gmra.mxu3 %vm180_vm4, %v1765_v17 }
0x1ced   :  { %v664_v20 = vpop.xlane.xlu1 %663 }
0x1cff   :  { %v340_v42 = vpop.xlane.xlu2 %339 }
0x1d00   :  { %v344_v6 = vsel %vm341_vm6, %v340_v42, 0.0 }
0x1d05   :  { %v984_v38 = vpop.permute.xlu1 %983 }
0x1d06   :  { %v986_v25 = vsel %vm180_vm4, %v984_v38, 0.0 }
0x1d41   :  { %v1785_v4 = vpop.f32.mrf.mxu3 }
0x1d42   :  { %v1788_v7 = vadd.f32 %v1785_v4, %v1682_v1 }
0x1d44   :  { %v1935_v10 = vmul.f32 -1.442695, %v1788_v7 }
0x1d46   :  { %2070 = vpow2.f32 %v1935_v10 }
0x1d4c   :  { %v2071_v43 = vpop.eup %2070 }
0x1d4d   :  { %v1792_v12 = vadd.f32 1.0, %v2071_v43 }
0x1d4f   :  { %2072 = vrcp.f32 %v1792_v12  ;;  %v1804_v16 = vand.u32 2147483648, %v1792_v12  ;;  %v1802_v61 = vand.u32 2147483647, %v1792_v12  ;;  %vm1798_vm2 = vweird.f32 %v1792_v12 }
0x1d51   :  { %v1805_v19 = vor.u32 1.1754944e-38, %v1804_v16  ;;  %vm1803_vm5 = vcmp.eq.f32.partialorder %v1802_v61, 8.507059e+37 }
0x1d55   :  { %v2073_v13 = vpop.eup %2072 }
0x1d56   :  { %v1794_v15 = vmul.f32 %v2073_v13, %v1792_v12  ;;  %vm1799_vm1 = vweird.f32 %v2073_v13 }
0x1d57   :  { %vm1800_vm3 = vmor %vm1798_vm2, %vm1799_vm1 }
0x1d58   :  { %v1795_v57 = vsub.f32 1.0, %v1794_v15 }
0x1d5a   :  { %v1796_v28 = vmul.f32 %v2073_v13, %v1795_v57 }
0x1d5c   :  { %v1797_v18 = vadd.f32 %v2073_v13, %v1796_v28 }
0x1d5e   :  { %v1801_v24 = vsel %vm1800_vm3, %v2073_v13, %v1797_v18 }
0x1d5f   :  { %v1806_v8 = vsel %vm1803_vm5, %v1805_v19, %v1801_v24 }
0x1d60   :  { %v1808_v14 = vmul.f32 2.0, %v1806_v8  ;;  %v1810_v52 = vmul.f32 %v1806_v8, %v2707_v21 }
0x1d62   :  { %v1936_v29 = vadd.f32 -1.0, %v1808_v14 }
0x1d64   :  { %1812 = vrot.lane.b32.xlu0 %v1936_v29, %s2175_s23 }
0x1d8e   :  { %501 = vadd.xlane.f32.xlu0 %v500_v37 }
0x1da2   :  { %821 = vrot.lane.b32.xlu0 %v819_v2, %s2176_s24 }
0x1dcc   :  { %987 = vadd.xlane.f32.xlu0 %v986_v25 }
0x1dd6   :  { %v1813_v39 = vpop.permute.xlu0 %1812 }
0x1dd7   :  { %v1815_v41 = vmul.f32 %v1813_v39, %v1806_v8 }
0x1dd9   :  { %1817 = vrot.lane.b32.xlu2 %v1815_v41, %s2176_s24 }
0x1de0   :  { %1649 = vrot.lane.b32.xlu0 %v1647_v33, %s2176_s24 }
0x1e01   :  { %v502_v36 = vpop.xlane.xlu0 %501 }
0x1e02   :  { %v506_v54 = vsel %vm503_vm7, %v502_v36, %v344_v6 }
0x1e03   :  { %v668_v50 = vsel %vm665_vm8, %v664_v20, %v506_v54 }
0x1e14   :  { %v822_v35 = vpop.permute.xlu0 %821 }
0x1e15   :  { %v824_v31 = vsel %vm180_vm4, %v822_v35, 0.0 }
0x1e16   :  { %825 = vadd.xlane.f32.xlu2 %v824_v31 }
0x1e33   :  { %v1818_v44 = vpop.permute.xlu2 %1817 }
0x1e34   :  { %v1820_v46 = vadd.f32 %v1818_v44, %v1810_v52 }
0x1e36   :  { %2074 = vtanh.f32 %v1820_v46 }
0x1e3c   :  { %v2075_v47 = vpop.eup %2074 }
0x1e3d   :  { %1823 = vrot.lane.b32.xlu1 %v2075_v47, %s2175_s23  ;;  %s1854_s23 = sshll.u32 %s2178_s9, 4  ;;  %s1855_s23 = int_to_ptr.vmem [resolvable:$true] %s1854_s23 }
0x1e3f   :  { %v988_v22 = vpop.xlane.xlu0 %987 }
0x1e45   :  { %1145 = vrot.lane.b32.xlu1 %v1143_v48, %s2176_s24 }
0x1e4d   :  { %1307 = vrot.lane.b32.xlu1 %v1305_v30, %s2176_s24 }
0x1e52   :  { %v1650_v27 = vpop.permute.xlu0 %1649 }
0x1e53   :  { %v1652_v21 = vsel %vm180_vm4, %v1650_v27, 0.0 }
0x1e54   :  { %1653 = vadd.xlane.f32.xlu0 %v1652_v21 }
0x1e55   :  { %1469 = vrot.lane.b32.xlu1 %v1467_v51, %s2176_s24 }
0x1e89   :  { %v826_v55 = vpop.xlane.xlu2 %825 }
0x1e8a   :  { %v830_v34 = vsel %vm827_vm9, %v826_v55, %v668_v50 }
0x1e8b   :  { %v992_v58 = vsel %vm989_vm10, %v988_v22, %v830_v34 }
0x1eaf   :  { %v1824_v59 = vpop.permute.xlu1 %1823 }
0x1eb0   :  { %v1826_v9 = vmul.f32 %v1824_v59, %v1806_v8 }
0x1eb2   :  { %v1827_v49 = vmul.f32 %v1826_v9, %v2725_v60 }
0x1eb7   :  { %v1146_v40 = vpop.permute.xlu1 %1145 }
0x1eb8   :  { %v1148_v23 = vsel %vm180_vm4, %v1146_v40, 0.0 }
0x1eb9   :  { %1149 = vadd.xlane.f32.xlu2 %v1148_v23 }
0x1ebf   :  { %v1308_v62 = vpop.permute.xlu1 %1307 }
0x1ec0   :  { %v1310_v11 = vsel %vm180_vm4, %v1308_v62, 0.0 }
0x1ec1   :  { %1311 = vadd.xlane.f32.xlu2 %v1310_v11 }
0x1ec7   :  { %v1470_v45 = vpop.permute.xlu1 %1469  ;;  %v1654_v60 = vpop.xlane.xlu0 %1653 }
0x1ec8   :  { %v1472_v63 = vsel %vm180_vm4, %v1470_v45, 0.0 }
0x1ec9   :  { %1473 = vadd.xlane.f32.xlu1 %v1472_v63 }
0x1ed9   :  { %1829 = vrot.lane.b32.xlu2 %v1827_v49, %s2176_s24 }
0x1ee2   :  { %1843 = vperm.xlu1 %1949, %v1955_v32  }
0x1f2c   :  { %v1150_v56 = vpop.xlane.xlu2 %1149 }
0x1f2d   :  { %v1154_v3 = vsel %vm1151_vm11, %v1150_v56, %v992_v58 }
0x1f34   :  { %v1312_v0 = vpop.xlane.xlu2 %1311 }
0x1f35   :  { %v1316_v17 = vsel %vm1313_vm12, %v1312_v0, %v1154_v3 }
0x1f3c   :  { %v1830_v5 = vpop.permute.xlu2 %1829  ;;  %v1474_v4 = vpop.xlane.xlu1 %1473 }
0x1f3d   :  { %v1832_v1 = vsel %vm180_vm4, %v1830_v5, 0.0  ;;  %v1478_v7 = vsel %vm1475_vm13, %v1474_v4, %v1316_v17 }
0x1f3e   :  { %1833 = vadd.xlane.f32.xlu2 %v1832_v1  ;;  %v1658_v12 = vsel %vm1655_vm14, %v1654_v60, %v1478_v7 }
0x1f54   :  { %v1844_v10 = vpop.permute.xlu1 %1843 }
0x1fb1   :  { %v1834_v43 = vpop.xlane.xlu2 %1833 }
0x1fb2   :  { %v1838_v13 = vsel %vm1835_vm15, %v1834_v43, %v1658_v12 }
0x1fb3   :  { %v1846_v15 = vadd.f32 %v1844_v10, %v1838_v13 }
0x1fb5   :  { %1848 = vst.msk [vmem:[#allocation9] sm:$0xff] %vm1847_vm0, %v1846_v15 }
0x1fb6   :  { %1859 = dma.vmem_to_hbm [thread:$0]  %s1855_s23, 128, %s1857_s29, [#allocation6]  }
0x1fb7   :  { %2167 = dma.done.wait [#allocation6], 128  }
0x1fb8   :  { %2168 = vsyncadd [#allocation6], 4294967168 }
0x1fb9   :  { %1864 = vsyncpa [#allocation5], 1 }
0x1fba   :  { %1865 = vsyncpa [#allocation8], 1 }
0x1fbb   :  { %1866 = vsyncpa [#allocation6], 1 }

</bundles_post_ra>
